<compile_context>
chip_gen: v5e
topology: v5e:2x2
jax: 0.10.0
libtpu: 0.0.40
codegen_flags: <defaults>
</compile_context>

<pallas_src>
import functools
import numpy as np
import jax
import jax.numpy as jnp
from jax.experimental import pallas as pl
from jax.experimental.pallas import tpu as pltpu


def _round_up(x, m):
    return ((x + m - 1) // m) * m


def _proj_row_tile(np_):
    # Big projection tiles amortize per-step overhead; must divide Np and be
    # a lane multiple (128) because the transposed ze output puts rows on lanes.
    for t in (512, 256, 128):
        if np_ % t == 0:
            return t
    return np_


def _bia_row_tile(np_):
    # Prefer 256-row tiles; for small inputs split into >=2 row tiles so the
    # parallel axis can be sharded across both v7x TensorCores.
    if np_ >= 512 and np_ % 256 == 0:
        return 256
    if np_ >= 256:
        return 128
    return max(np_ // 2, 8)           # Np == 128 -> 64 (2 tiles)


def _bia_col_tile(np_):
    for t in (512, 256, 128):
        if np_ % t == 0:
            return t
    return np_


# ----------------------------- Pallas kernels -----------------------------

def _proj_kernel(x_ref, wcat_ref, bcat_ref, zb_ref, zeT_ref, *, n_real, h, dp):
    """Fused begin/end projection + biaffine bias augmentation.

    x_ref:    (TM, Hp)   bf16 token vectors (zero-padded rows/cols)
    wcat_ref: (Hp, 2*Dp) bf16  -- [Wb^T | We^T], zero padded
    bcat_ref: (1,  2*Dp) f32   -- [bb | be], zero padded
    zb_ref:   (TM, Dp)   bf16: [:, :h]=tanh(xWb^T+bb), [:, h]=1 (real rows), else 0
    zeT_ref:  (Dp, TM)   bf16: pre-transposed end projection (rows = features),
                               so the biaffine second matmul is a standard
                               (TM,Dp)x(Dp,TN) MXU contraction downstream.
    """
    i = pl.program_id(0)
    tm = zb_ref.shape[0]
    y = jnp.dot(x_ref[...], wcat_ref[...],
                preferred_element_type=jnp.float32) + bcat_ref[...]
    z = jnp.tanh(y)                                            # (TM, 2*Dp) f32

    # begin projection: (TM, Dp), token rows on sublanes
    row = jax.lax.broadcasted_iota(jnp.int32, (tm, dp), 0) + i * tm
    col = jax.lax.broadcasted_iota(jnp.int32, (tm, dp), 1)
    zb = z[:, :dp]
    zb = jnp.where(col == h, 1.0, zb)                          # bias column
    zb = jnp.where(row < n_real, zb, 0.0)                      # zero padded rows
    zb_ref[...] = zb.astype(jnp.bfloat16)

    # end projection, transposed: (Dp, TM), token columns on lanes
    zt = z[:, dp:].T                                           # (Dp, TM) f32 (one XLU transpose per proj tile)
    feat = jax.lax.broadcasted_iota(jnp.int32, (dp, tm), 0)
    tok = jax.lax.broadcasted_iota(jnp.int32, (dp, tm), 1) + i * tm
    zt = jnp.where(feat == h, 1.0, zt)                         # bias feature row
    zt = jnp.where(tok < n_real, zt, 0.0)                      # zero padded tokens
    zeT_ref[...] = zt.astype(jnp.bfloat16)


def _make_biaffine_kernel(*, n_types, dp, compute_loss, want_logits):
    """Fused biaffine scoring (+ optional masked CE / accuracy, + optional
    bf16 logits write-out).  Grid = (row_tiles [parallel], col_tiles [arbitrary]).

    Per row tile i (once, at j == 0):
        tmp = Zb_tile @ W_all        -> bf16 VMEM scratch (TM, E*Dp)
    Per (i, j):
        for e: logit_e = tmp_e @ ZeT_col_tile       (TM, TN)  f32
    with online logsumexp / picked-logit / argmax; only per-tile scalar
    stats (and optionally bf16 logits) leave VMEM.
    """

    def kernel(*refs):
        idx = 0
        zb_ref = refs[idx]; idx += 1
        zeT_ref = refs[idx]; idx += 1
        wall_ref = refs[idx]; idx += 1
        labels_ref = None
        if compute_loss:
            labels_ref = refs[idx]; idx += 1
        logits_ref = None
        if want_logits:
            logits_ref = refs[idx]; idx += 1
        stats_ref = None
        if compute_loss:
            stats_ref = refs[idx]; idx += 1
        tmp_ref = refs[idx]                                    # (TM, E*Dp) bf16 scratch

        j = pl.program_id(1)

        @pl.when(j == 0)
        def _():
            # One wide MXU matmul per row tile, cached across column tiles.
            tmp_ref[...] = jnp.dot(
                zb_ref[...], wall_ref[...],
                preferred_element_type=jnp.float32).astype(jnp.bfloat16)

        zeT = zeT_ref[...]                                     # (Dp, TN) bf16

        def score(e):
            # Standard (TM,Dp)x(Dp,TN) contraction: no in-loop transpose.
            return jnp.dot(tmp_ref[:, e * dp:(e + 1) * dp], zeT,
                           preferred_element_type=jnp.float32)

        if not compute_loss:
            for e in range(n_types):                           # logits-only (inference)
                logits_ref[e] = score(e).astype(jnp.bfloat16)
            return

        labels = labels_ref[...]                               # (TM, TN) int32, -1 = invalid/padded
        mask = (labels >= 0).astype(jnp.float32)

        l0 = score(0)
        if want_logits:
            logits_ref[0] = l0.astype(jnp.bfloat16)
        m = l0                                                 # running max (== best value)
        s = jnp.ones_like(l0)                                  # running sum(exp(. - m))
        picked = jnp.where(labels == 0, l0, 0.0)               # gold-class logit
        best_idx = jnp.zeros(l0.shape, jnp.int32)
        for e in range(1, n_types):                            # E is small & static (unrolled)
            le = score(e)
            if want_logits:
                logits_ref[e] = le.astype(jnp.bfloat16)
            upd = le > m                                       # strict: first-max argmax
            best_idx = jnp.where(upd, e, best_idx)
            m_new = jnp.where(upd, le, m)                      # == maximum(m, le)
            s = s * jnp.exp(m - m_new) + jnp.exp(le - m_new)
            m = m_new
            picked = picked + jnp.where(labels == e, le, 0.0)

        ce = (m + jnp.log(s)) - picked                         # (TM, TN)
        loss_p = jnp.sum(ce * mask)
        acc_p = jnp.sum(jnp.where(best_idx == labels, 1.0, 0.0) * mask)

        # Pack the two per-tile scalars into a lane-dense (8, 128) block.
        pos = (jax.lax.broadcasted_iota(jnp.int32, (8, 128), 0) * 128 +
               jax.lax.broadcasted_iota(jnp.int32, (8, 128), 1))
        stats_ref[0, 0] = jnp.where(pos == 0, loss_p,
                                    jnp.where(pos == 1, acc_p, 0.0))

    return kernel


# ------------------------------ wrappers ----------------------------------

def prepare_params(params):
    """One-time parameter prep (hoisted out of forward): transpose, concat,
    pad to lane multiples, cast to bf16."""
    H = params["Wb"].shape[1]
    E, D, _ = params["W_bi"].shape            # D = H + 1 (bias_x = bias_y = True)
    Hp = _round_up(H, 128)
    Dp = _round_up(D, 128)
    wcat = jnp.zeros((Hp, 2 * Dp), jnp.float32)
    wcat = wcat.at[:H, 0:H].set(params["Wb"].T)
    wcat = wcat.at[:H, Dp:Dp + H].set(params["We"].T)
    bcat = jnp.zeros((1, 2 * Dp), jnp.float32)
    bcat = bcat.at[0, 0:H].set(params["bb"])
    bcat = bcat.at[0, Dp:Dp + H].set(params["be"])
    w_pad = jnp.zeros((E, Dp, Dp), jnp.float32).at[:, :D, :D].set(params["W_bi"])
    w_all = jnp.transpose(w_pad, (1, 0, 2)).reshape(Dp, E * Dp)
    return {"Wcat": wcat.astype(jnp.bfloat16),
            "bcat": bcat,
            "Wall": w_all.astype(jnp.bfloat16)}


def _project(x_pad, wcat, bcat, n_real, h):
    np_, hp = x_pad.shape
    dp2 = wcat.shape[1]
    dp = dp2 // 2
    tm = _proj_row_tile(np_)
    n_tiles = np_ // tm
    kern = functools.partial(_proj_kernel, n_real=n_real, h=h, dp=dp)
    return pl.pallas_call(
        kern,
        out_shape=(jax.ShapeDtypeStruct((np_, dp), jnp.bfloat16),    # zb_aug
                   jax.ShapeDtypeStruct((dp, np_), jnp.bfloat16)),   # zeT_aug
        grid=(n_tiles,),
        in_specs=[pl.BlockSpec((tm, hp), lambda i: (i, 0)),
                  pl.BlockSpec((hp, dp2), lambda i: (0, 0)),
                  pl.BlockSpec((1, dp2), lambda i: (0, 0))],
        out_specs=(pl.BlockSpec((tm, dp), lambda i: (i, 0)),
                   pl.BlockSpec((dp, tm), lambda i: (0, i))),
        compiler_params=pltpu.CompilerParams(
            dimension_semantics=("parallel",),
            vmem_limit_bytes=64 * 1024 * 1024),
    )(x_pad, wcat, bcat)


def _biaffine_call(zb_aug, zeT_aug, w_all, labels_enc, *, compute_loss, want_logits):
    np_, dp = zb_aug.shape
    n_types = w_all.shape[1] // dp
    tm = _bia_row_tile(np_)
    tn = _bia_col_tile(np_)
    n_ti, n_tj = np_ // tm, np_ // tn

    in_specs = [pl.BlockSpec((tm, dp), lambda i, j: (i, 0)),
                pl.BlockSpec((dp, tn), lambda i, j: (0, j)),
                pl.BlockSpec((dp, n_types * dp), lambda i, j: (0, 0))]
    inputs = [zb_aug, zeT_aug, w_all]
    if compute_loss:
        in_specs.append(pl.BlockSpec((tm, tn), lambda i, j: (i, j)))
        inputs.append(labels_enc)

    out_shapes, out_specs = [], []
    if want_logits:
        out_shapes.append(jax.ShapeDtypeStruct((n_types, np_, np_), jnp.bfloat16))
        out_specs.append(pl.BlockSpec((n_types, tm, tn), lambda i, j: (0, i, j)))
    if compute_loss:
        out_shapes.append(jax.ShapeDtypeStruct((n_ti, n_tj, 8, 128), jnp.float32))
        out_specs.append(pl.BlockSpec((1, 1, 8, 128), lambda i, j: (i, j, 0, 0)))

    kern = _make_biaffine_kernel(n_types=n_types, dp=dp,
                                 compute_loss=compute_loss, want_logits=want_logits)
    outs = pl.pallas_call(
        kern,
        out_shape=tuple(out_shapes),
        grid_spec=pltpu.PrefetchScalarGridSpec(
            num_scalar_prefetch=0,
            grid=(n_ti, n_tj),
            in_specs=in_specs,
            out_specs=tuple(out_specs),
            scratch_shapes=[pltpu.VMEM((tm, n_types * dp), jnp.bfloat16)]),
        compiler_params=pltpu.CompilerParams(
            dimension_semantics=("parallel", "arbitrary"),
            vmem_limit_bytes=64 * 1024 * 1024),
    )(*inputs)
    if not isinstance(outs, (tuple, list)):
        outs = (outs,)

    res, k = {}, 0
    if want_logits:
        res["logits"] = outs[k]; k += 1
    if compute_loss:
        res["stats"] = outs[k]; k += 1
    return res


def biaffine_ner_forward(token_vectors, prep, matrix_valid_span_mask=None,
                         matrix_gold_entity_type_labels=None, *,
                         compute_loss=True, return_logits=False,
                         torch_layout_logits=False):
    """Pallas implementation of BiaffineNERModel.forward (post-BERT part).

    Default training path (return_logits=False) writes no logits to HBM.
    return_logits=True emits E-major (E, N, N) bf16 logits;
    torch_layout_logits=True additionally materializes the (N, N, E) layout.
    """
    assert compute_loss or return_logits
    N, H = token_vectors.shape
    wcat, bcat, w_all = prep["Wcat"], prep["bcat"], prep["Wall"]
    Hp = wcat.shape[0]
    Np = _round_up(max(N, 1), 128)

    # ---- fused projections: tanh(Linear) + bias column + zeroed padding ----
    x_pad = jnp.zeros((Np, Hp), jnp.bfloat16).at[:N, :H].set(
        token_vectors.astype(jnp.bfloat16))
    zb_aug, zeT_aug = _project(x_pad, wcat, bcat, N, H)

    # ---- loss-side input: labels with -1 encoding invalid/padded spans ----
    labels_enc = None
    mask_f = None
    if compute_loss:
        mask_f = matrix_valid_span_mask.astype(jnp.float32)
        labels_i = matrix_gold_entity_type_labels.astype(jnp.int32)
        labels_valid = jnp.where(mask_f > 0, labels_i, -1)
        labels_enc = jnp.full((Np, Np), -1, jnp.int32).at[:N, :N].set(labels_valid)

    res = _biaffine_call(zb_aug, zeT_aug, w_all, labels_enc,
                         compute_loss=compute_loss, want_logits=return_logits)

    out = {}
    if return_logits:
        logits_emajor = res["logits"][:, :N, :N]               # (E, N, N) bf16
        out["logits_emajor"] = logits_emajor
        if torch_layout_logits:
            # Torch-layout (N, N, E): API compatibility only; gated behind a flag
            # because the transpose re-reads/re-writes the whole tensor.
            out["logits"] = jnp.transpose(logits_emajor, (1, 2, 0)).astype(jnp.float32)
    if compute_loss:
        stats = res["stats"]
        out["loss"] = jnp.sum(stats[:, :, 0, 0])
        out["acc"] = jnp.sum(stats[:, :, 0, 1])
        out["n_valid_spans"] = jnp.sum(mask_f).astype(jnp.int32)
    return out


# --------------------------- pure-JAX references ---------------------------

def _reference_forward_f32(token_vectors, params, mask_nn, labels_nn):
    zb = jnp.tanh(token_vectors @ params["Wb"].T + params["bb"])
    ze = jnp.tanh(token_vectors @ params["We"].T + params["be"])
    ones = jnp.ones((zb.shape[0], 1), jnp.float32)
    zb1 = jnp.concatenate([zb, ones], axis=-1)
    ze1 = jnp.concatenate([ze, ones], axis=-1)
    logits = jnp.einsum("xi,oij,yj->xyo", zb1, params["W_bi"], ze1)
    lse = jax.scipy.special.logsumexp(logits, axis=-1)
    picked = jnp.take_along_axis(logits, labels_nn[..., None], axis=-1)[..., 0]
    loss = jnp.sum((lse - picked) * mask_nn)
    pred = jnp.argmax(logits, axis=-1)
    acc = jnp.sum((pred == labels_nn).astype(jnp.float32) * mask_nn)
    return logits, loss, acc


def _reference_forward_bf16(token_vectors, params, mask_nn, labels_nn):
    """Reference with the same bf16 rounding points as the kernels
    (logits themselves kept in f32, as the loss path in the kernel uses)."""
    xb = token_vectors.astype(jnp.bfloat16)
    wb = params["Wb"].astype(jnp.bfloat16)
    we = params["We"].astype(jnp.bfloat16)
    zb = jnp.tanh(jnp.dot(xb, wb.T, preferred_element_type=jnp.float32)
                  + params["bb"]).astype(jnp.bfloat16)
    ze = jnp.tanh(jnp.dot(xb, we.T, preferred_element_type=jnp.float32)
                  + params["be"]).astype(jnp.bfloat16)
    ones = jnp.ones((zb.shape[0], 1), jnp.bfloat16)
    zb1 = jnp.concatenate([zb, ones], axis=-1)
    ze1 = jnp.concatenate([ze, ones], axis=-1)
    wbi = params["W_bi"].astype(jnp.bfloat16)
    tmp = jnp.einsum("xi,oij->oxj", zb1, wbi,
                     preferred_element_type=jnp.float32)
    logits = jnp.einsum("oxj,yj->xyo", tmp.astype(jnp.bfloat16), ze1,
                        preferred_element_type=jnp.float32)
    lse = jax.scipy.special.logsumexp(logits, axis=-1)
    picked = jnp.take_along_axis(logits, labels_nn[..., None], axis=-1)[..., 0]
    loss = jnp.sum((lse - picked) * mask_nn)
    pred = jnp.argmax(logits, axis=-1)
    acc = jnp.sum((pred == labels_nn).astype(jnp.float32) * mask_nn)
    return logits, loss, acc


# ---------------------------------- main -----------------------------------

if __name__ == "__main__":
    key = jax.random.PRNGKey(0)
    n_segments, max_seg_len = 2, 8
    vocab_size, H, E = 100, 32, 4          # hidden_dim, n_entity_types

    k_ids, k_emb, k_wb, k_bb, k_we, k_be, k_bi, k_lab = jax.random.split(key, 8)

    # "BERT input" -- segments of subtoken ids + mask (second segment padded)
    segments_id = jax.random.randint(k_ids, (n_segments, max_seg_len), 0,
                                     vocab_size, dtype=jnp.int32)
    segments_mask = jnp.array([[1] * 8, [1, 1, 1, 1, 0, 0, 0, 0]], jnp.int32)

    # Deterministic parameters
    params = {
        "Wb": 0.05 * jax.random.normal(k_wb, (H, H), jnp.float32),   # (out, in)
        "bb": 0.05 * jax.random.normal(k_bb, (H,), jnp.float32),
        "We": 0.05 * jax.random.normal(k_we, (H, H), jnp.float32),
        "be": 0.05 * jax.random.normal(k_be, (H,), jnp.float32),
        "W_bi": 0.05 * jax.random.normal(k_bi, (E, H + 1, H + 1), jnp.float32),
    }
    # Surrogate for the BERT encoder (see TODO(synk) above)
    emb_table = 0.5 * jax.random.normal(k_emb, (vocab_size, H), jnp.float32)

    # encode_tokens: masked-select of per-subtoken vectors (mask is concrete)
    segments_vec = emb_table[segments_id]                  # (n_seg, L, H)
    flat_idx = np.nonzero(np.asarray(segments_mask).reshape(-1))[0]
    token_vectors = segments_vec.reshape(-1, H)[flat_idx]  # (N, H)
    N = token_vectors.shape[0]                             # 12

    # Valid-span mask (upper triangular) and gold labels
    matrix_valid_span_mask = jnp.triu(jnp.ones((N, N), jnp.float32))
    matrix_gold_entity_type_labels = (
        jax.random.randint(k_lab, (N, N), 0, E, dtype=jnp.int32)
        * matrix_valid_span_mask.astype(jnp.int32))

    prep = prepare_params(params)      # one-time parameter prep (hoisted)

    fwd = jax.jit(biaffine_ner_forward,
                  static_argnames=("compute_loss", "return_logits",
                                   "torch_layout_logits"))

    # 1) Default training path: loss/acc only, NO logits HBM write.
    out_loss = fwd(token_vectors, prep, matrix_valid_span_mask,
                   matrix_gold_entity_type_labels,
                   compute_loss=True, return_logits=False)
    jax.block_until_ready(out_loss)

    # 2) Training path with bf16 E-major logits also emitted.
    out_full = fwd(token_vectors, prep, matrix_valid_span_mask,
                   matrix_gold_entity_type_labels,
                   compute_loss=True, return_logits=True)
    jax.block_until_ready(out_full)

    # 3) Inference path: logits-only kernel (no label stream, no CE math).
    out_inf = fwd(token_vectors, prep,
                  compute_loss=False, return_logits=True,
                  torch_layout_logits=True)
    jax.block_until_ready(out_inf)

    # References
    ref_logits_b, ref_loss_b, ref_acc_b = _reference_forward_bf16(
        token_vectors, params, matrix_valid_span_mask,
        matrix_gold_entity_type_labels)
    ref_logits_f, ref_loss_f, _ = _reference_forward_f32(
        token_vectors, params, matrix_valid_span_mask,
        matrix_gold_entity_type_labels)
    ref_emajor_b = np.transpose(np.asarray(ref_logits_b), (2, 0, 1))
    ref_emajor_f = np.transpose(np.asarray(ref_logits_f), (2, 0, 1))

    # ---- loss-only path checks (bf16-consistent reference) ----
    np.testing.assert_allclose(float(out_loss["loss"]), float(ref_loss_b),
                               rtol=1e-3, atol=1e-2)
    np.testing.assert_allclose(float(out_loss["acc"]), float(ref_acc_b),
                               rtol=0, atol=1e-5)
    assert int(out_loss["n_valid_spans"]) == int(
        np.asarray(matrix_valid_span_mask).sum())

    # ---- loss + logits path checks ----
    np.testing.assert_allclose(float(out_full["loss"]), float(ref_loss_b),
                               rtol=1e-3, atol=1e-2)
    np.testing.assert_allclose(float(out_full["acc"]), float(ref_acc_b),
                               rtol=0, atol=1e-5)
    ker_logits_full = np.asarray(out_full["logits_emajor"].astype(jnp.float32))
    np.testing.assert_allclose(ker_logits_full, ref_emajor_b,
                               rtol=1e-2, atol=1e-2)     # bf16-stored logits

    # ---- inference path checks ----
    ker_logits_inf = np.asarray(out_inf["logits_emajor"].astype(jnp.float32))
    np.testing.assert_allclose(ker_logits_inf, ref_emajor_b,
                               rtol=1e-2, atol=1e-2)
    np.testing.assert_allclose(np.asarray(out_inf["logits"]),
                               np.asarray(ref_logits_b),
                               rtol=1e-2, atol=1e-2)     # torch-layout (N,N,E)

    # Loose sanity check against the full-f32 reference (bf16 MXU inputs)
    np.testing.assert_allclose(ker_logits_inf, ref_emajor_f,
                               rtol=3e-2, atol=3e-2)
    np.testing.assert_allclose(float(out_loss["loss"]), float(ref_loss_f),
                               rtol=2e-2, atol=1.0)

    print("KERNEL_OK")
</pallas_src>

<mosaic_0001>
module attributes {stable_mosaic.version = 11 : i64} {
  func.func @_proj_kernel(%arg0: i32, %arg1: memref<128x128xbf16, #tpu.memory_space<vmem>>, %arg2: memref<128x256xbf16, #tpu.memory_space<vmem>>, %arg3: memref<1x256xf32, #tpu.memory_space<vmem>>, %arg4: memref<128x128xbf16, #tpu.memory_space<vmem>>, %arg5: memref<128x128xbf16, #tpu.memory_space<vmem>>) attributes {dimension_semantics = [#tpu.dimension_semantics<parallel>], iteration_bounds = array<i64: 1>, scalar_prefetch = 0 : i64, scratch_operands = 0 : i64, tpu.core_type = #tpu.core_type<tc>, window_params = [{transform_indices = @transform_0, window_bounds = array<i64: 128, 128>}, {pipeline_mode = #tpu.pipeline_mode<synchronous>, transform_indices = @transform_1, window_bounds = array<i64: 128, 256>}, {pipeline_mode = #tpu.pipeline_mode<synchronous>, transform_indices = @transform_2, window_bounds = array<i64: 1, 256>}, {transform_indices = @transform_3, window_bounds = array<i64: 128, 128>}, {transform_indices = @transform_4, window_bounds = array<i64: 128, 128>}]} {
    %c0 = arith.constant 0 : index
    %c0_0 = arith.constant 0 : index
    %0 = vector.load %arg1[%c0, %c0_0] : memref<128x128xbf16, #tpu.memory_space<vmem>>, vector<128x128xbf16>
    %c0_1 = arith.constant 0 : index
    %c0_2 = arith.constant 0 : index
    %1 = vector.load %arg2[%c0_1, %c0_2] : memref<128x256xbf16, #tpu.memory_space<vmem>>, vector<128x256xbf16>
    %cst = arith.constant dense<0.000000e+00> : vector<128x256xf32>
    %2 = tpu.matmul %0, %1, %cst {dimension_numbers = #tpu.dot_dimension_numbers<[1], [0], [0], [1], [0, 0, 1, 1], [], []>} : vector<128x128xbf16>, vector<128x256xbf16>, vector<128x256xf32> -> vector<128x256xf32>
    %c0_3 = arith.constant 0 : index
    %c0_4 = arith.constant 0 : index
    %3 = vector.load %arg3[%c0_3, %c0_4] : memref<1x256xf32, #tpu.memory_space<vmem>>, vector<1x256xf32>
    %4 = vector.broadcast %3 : vector<1x256xf32> to vector<128x256xf32>
    %5 = arith.addf %2, %4 : vector<128x256xf32>
    %6 = math.tanh %5 : vector<128x256xf32>
    %7 = tpu.iota {dimensions = array<i32: 0>} : vector<128x128xi32>
    %c128_i32 = arith.constant 128 : i32
    %8 = arith.muli %arg0, %c128_i32 : i32
    %9 = vector.broadcast %8 : i32 to vector<128x128xi32>
    %10 = arith.addi %7, %9 : vector<128x128xi32>
    %11 = tpu.iota {dimensions = array<i32: 1>} : vector<128x128xi32>
    %12 = vector.extract_strided_slice %6 {offsets = [0, 0], sizes = [128, 128], strides = [1, 1]} : vector<128x256xf32> to vector<128x128xf32>
    %c32_i32 = arith.constant 32 : i32
    %13 = vector.broadcast %c32_i32 : i32 to vector<128x128xi32>
    %14 = arith.cmpi eq, %11, %13 : vector<128x128xi32>
    %cst_5 = arith.constant 1.000000e+00 : f32
    %15 = vector.broadcast %cst_5 : f32 to vector<128x128xf32>
    %16 = arith.select %14, %15, %12 : vector<128x128xi1>, vector<128x128xf32>
    %c12_i32 = arith.constant 12 : i32
    %17 = vector.broadcast %c12_i32 : i32 to vector<128x128xi32>
    %18 = arith.cmpi slt, %10, %17 : vector<128x128xi32>
    %cst_6 = arith.constant 0.000000e+00 : f32
    %19 = vector.broadcast %cst_6 : f32 to vector<128x128xf32>
    %20 = arith.select %18, %16, %19 : vector<128x128xi1>, vector<128x128xf32>
    %21 = arith.truncf %20 : vector<128x128xf32> to vector<128x128xbf16>
    %c0_7 = arith.constant 0 : index
    %c0_8 = arith.constant 0 : index
    %22 = vector.load %arg4[%c0_7, %c0_8] : memref<128x128xbf16, #tpu.memory_space<vmem>>, vector<128x128xbf16>
    tpu.vector_store %arg4[%c0_7, %c0_8], %21 {strides = array<i32>} : memref<128x128xbf16, #tpu.memory_space<vmem>>, vector<128x128xbf16>,
    %23 = vector.extract_strided_slice %6 {offsets = [0, 128], sizes = [128, 128], strides = [1, 1]} : vector<128x256xf32> to vector<128x128xf32>
    %24 = tpu.transpose %23, [1, 0] : vector<128x128xf32> -> vector<128x128xf32>
    %25 = tpu.iota {dimensions = array<i32: 0>} : vector<128x128xi32>
    %26 = tpu.iota {dimensions = array<i32: 1>} : vector<128x128xi32>
    %c128_i32_9 = arith.constant 128 : i32
    %27 = arith.muli %arg0, %c128_i32_9 : i32
    %28 = vector.broadcast %27 : i32 to vector<128x128xi32>
    %29 = arith.addi %26, %28 : vector<128x128xi32>
    %c32_i32_10 = arith.constant 32 : i32
    %30 = vector.broadcast %c32_i32_10 : i32 to vector<128x128xi32>
    %31 = arith.cmpi eq, %25, %30 : vector<128x128xi32>
    %cst_11 = arith.constant 1.000000e+00 : f32
    %32 = vector.broadcast %cst_11 : f32 to vector<128x128xf32>
    %33 = arith.select %31, %32, %24 : vector<128x128xi1>, vector<128x128xf32>
    %c12_i32_12 = arith.constant 12 : i32
    %34 = vector.broadcast %c12_i32_12 : i32 to vector<128x128xi32>
    %35 = arith.cmpi slt, %29, %34 : vector<128x128xi32>
    %cst_13 = arith.constant 0.000000e+00 : f32
    %36 = vector.broadcast %cst_13 : f32 to vector<128x128xf32>
    %37 = arith.select %35, %33, %36 : vector<128x128xi1>, vector<128x128xf32>
    %38 = arith.truncf %37 : vector<128x128xf32> to vector<128x128xbf16>
    %c0_14 = arith.constant 0 : index
    %c0_15 = arith.constant 0 : index
    %39 = vector.load %arg5[%c0_14, %c0_15] : memref<128x128xbf16, #tpu.memory_space<vmem>>, vector<128x128xbf16>
    tpu.vector_store %arg5[%c0_14, %c0_15], %38 {strides = array<i32>} : memref<128x128xbf16, #tpu.memory_space<vmem>>, vector<128x128xbf16>,
    return
  }
  func.func @transform_0(%arg0: i32) -> (i32, i32) {
    %c0_i32 = arith.constant 0 : i32
    %c0_i32_0 = arith.constant 0 : i32
    return %arg0, %c0_i32 : i32, i32
  }
  func.func @transform_1(%arg0: i32) -> (i32, i32) {
    %c0_i32 = arith.constant 0 : i32
    %c0_i32_0 = arith.constant 0 : i32
    %c0_i32_1 = arith.constant 0 : i32
    return %c0_i32, %c0_i32_0 : i32, i32
  }
  func.func @transform_2(%arg0: i32) -> (i32, i32) {
    %c0_i32 = arith.constant 0 : i32
    %c0_i32_0 = arith.constant 0 : i32
    %c0_i32_1 = arith.constant 0 : i32
    return %c0_i32, %c0_i32_0 : i32, i32
  }
  func.func @transform_3(%arg0: i32) -> (i32, i32) {
    %c0_i32 = arith.constant 0 : i32
    %c0_i32_0 = arith.constant 0 : i32
    return %arg0, %c0_i32 : i32, i32
  }
  func.func @transform_4(%arg0: i32) -> (i32, i32) {
    %c0_i32 = arith.constant 0 : i32
    %c0_i32_0 = arith.constant 0 : i32
    return %c0_i32, %arg0 : i32, i32
  }
}

module attributes {stable_mosaic.version = 11 : i64} {
  func.func @kernel(%arg0: i32, %arg1: i32, %arg2: memref<64x128xbf16, #tpu.memory_space<vmem>>, %arg3: memref<128x128xbf16, #tpu.memory_space<vmem>>, %arg4: memref<128x512xbf16, #tpu.memory_space<vmem>>, %arg5: memref<64x128xi32, #tpu.memory_space<vmem>>, %arg6: memref<1x1x8x128xf32, #tpu.memory_space<vmem>>, %arg7: memref<64x512xbf16, #tpu.memory_space<vmem>>) attributes {dimension_semantics = [#tpu.dimension_semantics<parallel>, #tpu.dimension_semantics<arbitrary>], iteration_bounds = array<i64: 2, 1>, scalar_prefetch = 0 : i64, scratch_operands = 1 : i64, tpu.core_type = #tpu.core_type<tc>, window_params = [{transform_indices = @transform_0, window_bounds = array<i64: 64, 128>}, {transform_indices = @transform_1, window_bounds = array<i64: 128, 128>}, {pipeline_mode = #tpu.pipeline_mode<synchronous>, transform_indices = @transform_2, window_bounds = array<i64: 128, 512>}, {transform_indices = @transform_3, window_bounds = array<i64: 64, 128>}, {transform_indices = @transform_4, window_bounds = array<i64: 1, 1, 8, 128>}]} {
    %c0_i32 = arith.constant 0 : i32
    %0 = arith.cmpi eq, %arg1, %c0_i32 : i32
    %1 = arith.extui %0 : i1 to i32
    %c0_i32_0 = arith.constant 0 : i32
    %2 = arith.cmpi ne, %1, %c0_i32_0 : i32
    scf.if %2 {
      %c0_34 = arith.constant 0 : index
      %c0_35 = arith.constant 0 : index
      %102 = vector.load %arg2[%c0_34, %c0_35] : memref<64x128xbf16, #tpu.memory_space<vmem>>, vector<64x128xbf16>
      %c0_36 = arith.constant 0 : index
      %c0_37 = arith.constant 0 : index
      %103 = vector.load %arg4[%c0_36, %c0_37] : memref<128x512xbf16, #tpu.memory_space<vmem>>, vector<128x512xbf16>
      %cst_38 = arith.constant dense<0.000000e+00> : vector<64x512xf32>
      %104 = tpu.matmul %102, %103, %cst_38 {dimension_numbers = #tpu.dot_dimension_numbers<[1], [0], [0], [1], [0, 0, 1, 1], [], []>} : vector<64x128xbf16>, vector<128x512xbf16>, vector<64x512xf32> -> vector<64x512xf32>
      %105 = arith.truncf %104 : vector<64x512xf32> to vector<64x512xbf16>
      %c0_39 = arith.constant 0 : index
      %c0_40 = arith.constant 0 : index
      %106 = vector.load %arg7[%c0_39, %c0_40] : memref<64x512xbf16, #tpu.memory_space<vmem>>, vector<64x512xbf16>
      tpu.vector_store %arg7[%c0_39, %c0_40], %105 {strides = array<i32>} : memref<64x512xbf16, #tpu.memory_space<vmem>>, vector<64x512xbf16>,
    } else {
    }
    %c0 = arith.constant 0 : index
    %c0_1 = arith.constant 0 : index
    %3 = vector.load %arg3[%c0, %c0_1] : memref<128x128xbf16, #tpu.memory_space<vmem>>, vector<128x128xbf16>
    %c0_2 = arith.constant 0 : index
    %c0_3 = arith.constant 0 : index
    %4 = vector.load %arg5[%c0_2, %c0_3] : memref<64x128xi32, #tpu.memory_space<vmem>>, vector<64x128xi32>
    %c0_i32_4 = arith.constant 0 : i32
    %5 = vector.broadcast %c0_i32_4 : i32 to vector<64x128xi32>
    %6 = arith.cmpi sge, %4, %5 : vector<64x128xi32>
    %7 = arith.extui %6 : vector<64x128xi1> to vector<64x128xi32>
    %8 = arith.sitofp %7 : vector<64x128xi32> to vector<64x128xf32>
    %c0_5 = arith.constant 0 : index
    %c0_6 = arith.constant 0 : index
    %9 = vector.load %arg7[%c0_5, %c0_6] : memref<64x512xbf16, #tpu.memory_space<vmem>>, vector<64x128xbf16>
    %cst = arith.constant dense<0.000000e+00> : vector<64x128xf32>
    %10 = tpu.matmul %9, %3, %cst {dimension_numbers = #tpu.dot_dimension_numbers<[1], [0], [0], [1], [0, 0, 1, 1], [], []>} : vector<64x128xbf16>, vector<128x128xbf16>, vector<64x128xf32> -> vector<64x128xf32>
    %cst_7 = arith.constant 1.000000e+00 : f32
    %11 = vector.broadcast %cst_7 : f32 to vector<64x128xf32>
    %c0_i32_8 = arith.constant 0 : i32
    %12 = vector.broadcast %c0_i32_8 : i32 to vector<64x128xi32>
    %13 = arith.cmpi eq, %4, %12 : vector<64x128xi32>
    %cst_9 = arith.constant 0.000000e+00 : f32
    %14 = vector.broadcast %cst_9 : f32 to vector<64x128xf32>
    %15 = arith.select %13, %10, %14 : vector<64x128xi1>, vector<64x128xf32>
    %c0_i32_10 = arith.constant 0 : i32
    %16 = vector.broadcast %c0_i32_10 : i32 to vector<64x128xi32>
    %c0_11 = arith.constant 0 : index
    %c128 = arith.constant 128 : index
    %17 = vector.load %arg7[%c0_11, %c128] : memref<64x512xbf16, #tpu.memory_space<vmem>>, vector<64x128xbf16>
    %cst_12 = arith.constant dense<0.000000e+00> : vector<64x128xf32>
    %18 = tpu.matmul %17, %3, %cst_12 {dimension_numbers = #tpu.dot_dimension_numbers<[1], [0], [0], [1], [0, 0, 1, 1], [], []>} : vector<64x128xbf16>, vector<128x128xbf16>, vector<64x128xf32> -> vector<64x128xf32>
    %19 = arith.cmpf ogt, %18, %10 : vector<64x128xf32>
    %c1_i32 = arith.constant 1 : i32
    %20 = vector.broadcast %c1_i32 : i32 to vector<64x128xi32>
    %21 = arith.select %19, %20, %16 : vector<64x128xi1>, vector<64x128xi32>
    %22 = arith.select %19, %18, %10 : vector<64x128xi1>, vector<64x128xf32>
    %23 = arith.subf %10, %22 : vector<64x128xf32>
    %24 = math.exp %23 : vector<64x128xf32>
    %25 = arith.mulf %11, %24 : vector<64x128xf32>
    %26 = arith.subf %18, %22 : vector<64x128xf32>
    %27 = math.exp %26 : vector<64x128xf32>
    %28 = arith.addf %25, %27 : vector<64x128xf32>
    %c1_i32_13 = arith.constant 1 : i32
    %29 = vector.broadcast %c1_i32_13 : i32 to vector<64x128xi32>
    %30 = arith.cmpi eq, %4, %29 : vector<64x128xi32>
    %cst_14 = arith.constant 0.000000e+00 : f32
    %31 = vector.broadcast %cst_14 : f32 to vector<64x128xf32>
    %32 = arith.select %30, %18, %31 : vector<64x128xi1>, vector<64x128xf32>
    %33 = arith.addf %15, %32 : vector<64x128xf32>
    %c0_15 = arith.constant 0 : index
    %c256 = arith.constant 256 : index
    %34 = vector.load %arg7[%c0_15, %c256] : memref<64x512xbf16, #tpu.memory_space<vmem>>, vector<64x128xbf16>
    %cst_16 = arith.constant dense<0.000000e+00> : vector<64x128xf32>
    %35 = tpu.matmul %34, %3, %cst_16 {dimension_numbers = #tpu.dot_dimension_numbers<[1], [0], [0], [1], [0, 0, 1, 1], [], []>} : vector<64x128xbf16>, vector<128x128xbf16>, vector<64x128xf32> -> vector<64x128xf32>
    %36 = arith.cmpf ogt, %35, %22 : vector<64x128xf32>
    %c2_i32 = arith.constant 2 : i32
    %37 = vector.broadcast %c2_i32 : i32 to vector<64x128xi32>
    %38 = arith.select %36, %37, %21 : vector<64x128xi1>, vector<64x128xi32>
    %39 = arith.select %36, %35, %22 : vector<64x128xi1>, vector<64x128xf32>
    %40 = arith.subf %22, %39 : vector<64x128xf32>
    %41 = math.exp %40 : vector<64x128xf32>
    %42 = arith.mulf %28, %41 : vector<64x128xf32>
    %43 = arith.subf %35, %39 : vector<64x128xf32>
    %44 = math.exp %43 : vector<64x128xf32>
    %45 = arith.addf %42, %44 : vector<64x128xf32>
    %c2_i32_17 = arith.constant 2 : i32
    %46 = vector.broadcast %c2_i32_17 : i32 to vector<64x128xi32>
    %47 = arith.cmpi eq, %4, %46 : vector<64x128xi32>
    %cst_18 = arith.constant 0.000000e+00 : f32
    %48 = vector.broadcast %cst_18 : f32 to vector<64x128xf32>
    %49 = arith.select %47, %35, %48 : vector<64x128xi1>, vector<64x128xf32>
    %50 = arith.addf %33, %49 : vector<64x128xf32>
    %c0_19 = arith.constant 0 : index
    %c384 = arith.constant 384 : index
    %51 = vector.load %arg7[%c0_19, %c384] : memref<64x512xbf16, #tpu.memory_space<vmem>>, vector<64x128xbf16>
    %cst_20 = arith.constant dense<0.000000e+00> : vector<64x128xf32>
    %52 = tpu.matmul %51, %3, %cst_20 {dimension_numbers = #tpu.dot_dimension_numbers<[1], [0], [0], [1], [0, 0, 1, 1], [], []>} : vector<64x128xbf16>, vector<128x128xbf16>, vector<64x128xf32> -> vector<64x128xf32>
    %53 = arith.cmpf ogt, %52, %39 : vector<64x128xf32>
    %c3_i32 = arith.constant 3 : i32
    %54 = vector.broadcast %c3_i32 : i32 to vector<64x128xi32>
    %55 = arith.select %53, %54, %38 : vector<64x128xi1>, vector<64x128xi32>
    %56 = arith.select %53, %52, %39 : vector<64x128xi1>, vector<64x128xf32>
    %57 = arith.subf %39, %56 : vector<64x128xf32>
    %58 = math.exp %57 : vector<64x128xf32>
    %59 = arith.mulf %45, %58 : vector<64x128xf32>
    %60 = arith.subf %52, %56 : vector<64x128xf32>
    %61 = math.exp %60 : vector<64x128xf32>
    %62 = arith.addf %59, %61 : vector<64x128xf32>
    %c3_i32_21 = arith.constant 3 : i32
    %63 = vector.broadcast %c3_i32_21 : i32 to vector<64x128xi32>
    %64 = arith.cmpi eq, %4, %63 : vector<64x128xi32>
    %cst_22 = arith.constant 0.000000e+00 : f32
    %65 = vector.broadcast %cst_22 : f32 to vector<64x128xf32>
    %66 = arith.select %64, %52, %65 : vector<64x128xi1>, vector<64x128xf32>
    %67 = arith.addf %50, %66 : vector<64x128xf32>
    %68 = math.log %62 : vector<64x128xf32>
    %69 = arith.addf %56, %68 : vector<64x128xf32>
    %70 = arith.subf %69, %67 : vector<64x128xf32>
    %71 = arith.mulf %70, %8 : vector<64x128xf32>
    %72 = vector.shape_cast %71 : vector<64x128xf32> to vector<1x64x128xf32>
    %cst_23 = arith.constant dense<0.000000e+00> : vector<1xf32>
    %73 = vector.multi_reduction <add>, %72, %cst_23 [1, 2] : vector<1x64x128xf32> to vector<1xf32>
    %74 = vector.shape_cast %73 : vector<1xf32> to vector<1x1x1xf32>
    %75 = vector.extract %74[0, 0, 0] : f32 from vector<1x1x1xf32>
    %76 = arith.cmpi eq, %55, %4 : vector<64x128xi32>
    %cst_24 = arith.constant 1.000000e+00 : f32
    %cst_25 = arith.constant 0.000000e+00 : f32
    %77 = vector.broadcast %cst_24 : f32 to vector<64x128xf32>
    %78 = vector.broadcast %cst_25 : f32 to vector<64x128xf32>
    %79 = arith.select %76, %77, %78 : vector<64x128xi1>, vector<64x128xf32>
    %80 = arith.mulf %79, %8 : vector<64x128xf32>
    %81 = vector.shape_cast %80 : vector<64x128xf32> to vector<1x64x128xf32>
    %cst_26 = arith.constant dense<0.000000e+00> : vector<1xf32>
    %82 = vector.multi_reduction <add>, %81, %cst_26 [1, 2] : vector<1x64x128xf32> to vector<1xf32>
    %83 = vector.shape_cast %82 : vector<1xf32> to vector<1x1x1xf32>
    %84 = vector.extract %83[0, 0, 0] : f32 from vector<1x1x1xf32>
    %85 = tpu.iota {dimensions = array<i32: 0>} : vector<8x128xi32>
    %c128_i32 = arith.constant 128 : i32
    %86 = vector.broadcast %c128_i32 : i32 to vector<8x128xi32>
    %87 = arith.muli %85, %86 : vector<8x128xi32>
    %88 = tpu.iota {dimensions = array<i32: 1>} : vector<8x128xi32>
    %89 = arith.addi %87, %88 : vector<8x128xi32>
    %c0_i32_27 = arith.constant 0 : i32
    %90 = vector.broadcast %c0_i32_27 : i32 to vector<8x128xi32>
    %91 = arith.cmpi eq, %89, %90 : vector<8x128xi32>
    %c1_i32_28 = arith.constant 1 : i32
    %92 = vector.broadcast %c1_i32_28 : i32 to vector<8x128xi32>
    %93 = arith.cmpi eq, %89, %92 : vector<8x128xi32>
    %cst_29 = arith.constant 0.000000e+00 : f32
    %94 = vector.broadcast %84 : f32 to vector<8x128xf32>
    %95 = vector.broadcast %cst_29 : f32 to vector<8x128xf32>
    %96 = arith.select %93, %94, %95 : vector<8x128xi1>, vector<8x128xf32>
    %97 = vector.broadcast %75 : f32 to vector<8x128xf32>
    %98 = arith.select %91, %97, %96 : vector<8x128xi1>, vector<8x128xf32>
    %c0_30 = arith.constant 0 : index
    %c0_31 = arith.constant 0 : index
    %c0_32 = arith.constant 0 : index
    %c0_33 = arith.constant 0 : index
    %99 = vector.load %arg6[%c0_30, %c0_31, %c0_32, %c0_33] : memref<1x1x8x128xf32, #tpu.memory_space<vmem>>, vector<1x1x8x128xf32>
    %100 = vector.shape_cast %99 : vector<1x1x8x128xf32> to vector<8x128xf32>
    %101 = vector.shape_cast %98 : vector<8x128xf32> to vector<1x1x8x128xf32>
    tpu.vector_store %arg6[%c0_30, %c0_31, %c0_32, %c0_33], %101 {strides = array<i32>} : memref<1x1x8x128xf32, #tpu.memory_space<vmem>>, vector<1x1x8x128xf32>,
    return
  }
  func.func @transform_0(%arg0: i32, %arg1: i32) -> (i32, i32) {
    %c0_i32 = arith.constant 0 : i32
    %c0_i32_0 = arith.constant 0 : i32
    return %arg0, %c0_i32 : i32, i32
  }
  func.func @transform_1(%arg0: i32, %arg1: i32) -> (i32, i32) {
    %c0_i32 = arith.constant 0 : i32
    %c0_i32_0 = arith.constant 0 : i32
    return %c0_i32, %arg1 : i32, i32
  }
  func.func @transform_2(%arg0: i32, %arg1: i32) -> (i32, i32) {
    %c0_i32 = arith.constant 0 : i32
    %c0_i32_0 = arith.constant 0 : i32
    %c0_i32_1 = arith.constant 0 : i32
    return %c0_i32, %c0_i32_0 : i32, i32
  }
  func.func @transform_3(%arg0: i32, %arg1: i32) -> (i32, i32) {
    %c0_i32 = arith.constant 0 : i32
    return %arg0, %arg1 : i32, i32
  }
  func.func @transform_4(%arg0: i32, %arg1: i32) -> (i32, i32, i32, i32) {
    %c0_i32 = arith.constant 0 : i32
    %c0_i32_0 = arith.constant 0 : i32
    %c0_i32_1 = arith.constant 0 : i32
    return %arg0, %arg1, %c0_i32, %c0_i32_0 : i32, i32, i32, i32
  }
}

</mosaic_0001>

<bundles_post_ra>
// kernel: biaffine_ner_forward.2
= control target key start
LH: loop header
LB: loop body
LE: loop exit
PB: predicated region body
PF: predicated region fallthrough
CT: control target
= control target key end

     0   :  { %10 = vsyncpa [#allocation3], 0  ;;  %s865_s18 = smov [#allocation2]   ;;  %s866_s20 = smov 128   ;;  %s1062_s0 = inlined_call_operand.vmem [shape: bf16[128,128], index: 0, kind: input, shape index: {}]   ;;  %s1063_s1 = inlined_call_operand.hbm [shape: bf16[128,256], index: 1, kind: input, shape index: {}]   ;;  %s1064_s2 = inlined_call_operand.vmem [shape: f32[1,256], index: 2, kind: input, shape index: {}]   ;;  %s1065_s3 = inlined_call_operand.vmem [shape: bf16[128,128], index: 3, kind: output, shape index: {0}]   ;;  %s1066_s4 = inlined_call_operand.vmem [shape: bf16[128,128], index: 4, kind: output, shape index: {1}]  }
   0x1   :  { %s17_s17 = sshll.u32 %s1063_s1, 4  ;;  %s19_s19 = sshll.u32 %s865_s18, 4  ;;  %s18_s17 = int_to_ptr.hbm [resolvable:$true] %s17_s17  ;;  %s20_s19 = int_to_ptr.vmem [resolvable:$true] %s19_s19 }
   0x2   :  { %s867_s21 = smov 8  }
   0x3   :  { %25 = dma.hbm_to_vmem [thread:$0]  %s18_s17, 2048, %s20_s19, [#allocation3], %s866_s20, %s866_s20, %s867_s21  }
   0x4   :  { %863 = dma.done.wait [#allocation3], 2048  }
   0x5   :  { %864 = vsyncadd [#allocation3], 4294965248  ;;  %v868_v0 = vmov 0.0|0.0   ;;  %v687_v3 = vld [vmem:[#allocation2 + $0x74] sm:$0xf]  ;;  %v921_v27 = vld [vmem:[%s1062_s0] sm:$0xff] }
   0x6   :  { %v695_v1 = vunpack.c.l.bf16 %v868_v0  ;;  %v661_v4 = vld [vmem:[#allocation2 + $0x78] sm:$0xf0]  ;;  %v685_v6 = vld [vmem:[#allocation2 + $0x64] sm:$0xf]  ;;  %v653_v7 = vld [vmem:[#allocation2 + $0x68] sm:$0xf0] }
   0x7   :  { %v664_v5 = vor.u32 %v687_v3, %v661_v4  ;;  %v656_v8 = vor.u32 %v685_v6, %v653_v7  ;;  %v683_v9 = vld [vmem:[#allocation2 + $0x54] sm:$0xf]  ;;  %v645_v10 = vld [vmem:[#allocation2 + $0x58] sm:$0xf0]  ;;  %v681_v12 = vld [vmem:[#allocation2 + $0x44] sm:$0xf] }
   0x8   :  { %v697_v2 = vpack.c.bf16 %v695_v1, %v695_v1  ;;  %v648_v11 = vor.u32 %v683_v9, %v645_v10  ;;  %v637_v13 = vld [vmem:[#allocation2 + $0x48] sm:$0xf0]  ;;  %v679_v15 = vld [vmem:[#allocation2 + $0x34] sm:$0xf]  ;;  %v629_v16 = vld [vmem:[#allocation2 + $0x38] sm:$0xf0] }
   0x9   :  { %247 = vmatpush.bf16.msra.mxu1 %v664_v5  ;;  %791 = vmatpush.bf16.msra.mxu3 %v664_v5  ;;  %v640_v14 = vor.u32 %v681_v12, %v637_v13  ;;  %v632_v17 = vor.u32 %v679_v15, %v629_v16  ;;  %v677_v18 = vld [vmem:[#allocation2 + $0x24] sm:$0xf]  ;;  %v621_v19 = vld [vmem:[#allocation2 + $0x28] sm:$0xf0]  ;;  %v675_v21 = vld [vmem:[#allocation2 + $0x14] sm:$0xf] }
   0xa   :  { %769 = vst [vmem:[%s1065_s3 + $0x8] sm:$0xff] %v697_v2   ;;  %v624_v20 = vor.u32 %v677_v18, %v621_v19  ;;  %v613_v22 = vld [vmem:[#allocation2 + $0x18] sm:$0xf0]  ;;  %v673_v24 = vld [vmem:[#allocation2 + $0x4] sm:$0xf]  ;;  %v927_v28 = vld [vmem:[%s1062_s0 + $0x8] sm:$0xff] }
   0xb   :  { %770 = vst [vmem:[%s1065_s3 + $0x10] sm:$0xff] %v697_v2   ;;  %v616_v23 = vor.u32 %v675_v21, %v613_v22  ;;  %v605_v25 = vld [vmem:[#allocation2 + $0x8] sm:$0xf0]  ;;  %v933_v29 = vld [vmem:[%s1062_s0 + $0x20] sm:$0xff]  ;;  %v939_v30 = vld [vmem:[%s1062_s0 + $0x10] sm:$0xff] }
   0xc   :  { %771 = vst [vmem:[%s1065_s3 + $0x18] sm:$0xff] %v697_v2   ;;  %v608_v26 = vor.u32 %v673_v24, %v605_v25  ;;  %v944_v31 = vld [vmem:[%s1062_s0 + $0x28] sm:$0xff]  ;;  %v951_v32 = vld [vmem:[%s1062_s0 + $0x18] sm:$0xff]  ;;  %v956_v33 = vld [vmem:[%s1062_s0 + $0x30] sm:$0xff] }
   0xd   :  { %772 = vst [vmem:[%s1065_s3 + $0x20] sm:$0xff] %v697_v2   ;;  %248 = vmatpush.bf16.msra.mxu1 %v656_v8  ;;  %792 = vmatpush.bf16.msra.mxu3 %v656_v8  ;;  %v963_v34 = vld [vmem:[%s1062_s0 + $0x38] sm:$0xff]  ;;  %v969_v35 = vld [vmem:[%s1064_s2] sm:$0x3]  ;;  %v659_v51 = vld [vmem:[#allocation2 + $0x70] sm:$0xf] }
   0xe   :  { %773 = vst [vmem:[%s1065_s3 + $0x28] sm:$0xff] %v697_v2   ;;  %v972_v36 = vperm.slane %v969_v35, 1  ;;  %v688_v52 = vld [vmem:[#allocation2 + $0x74] sm:$0xf0]  ;;  %v651_v57 = vld [vmem:[#allocation2 + $0x60] sm:$0xf] }
   0xf   :  { %774 = vst [vmem:[%s1065_s3 + $0x30] sm:$0xff] %v697_v2   ;;  %v660_v53 = vor.u32 %v688_v52, %v659_v51  ;;  %v686_v58 = vld [vmem:[#allocation2 + $0x64] sm:$0xf0]  ;;  %v643_v60 = vld [vmem:[#allocation2 + $0x50] sm:$0xf] }
  0x10   :  { %775 = vst [vmem:[%s1065_s3 + $0x38] sm:$0xff] %v697_v2   ;;  %v652_v59 = vor.u32 %v686_v58, %v651_v57  ;;  %v684_v61 = vld [vmem:[#allocation2 + $0x54] sm:$0xf0]  ;;  %v635_v3 = vld [vmem:[#allocation2 + $0x40] sm:$0xf] }
  0x11   :  { %249 = vmatpush.bf16.msra.mxu1 %v648_v11  ;;  %793 = vmatpush.bf16.msra.mxu3 %v648_v11  ;;  %v644_v62 = vor.u32 %v684_v61, %v643_v60  ;;  %v682_v4 = vld [vmem:[#allocation2 + $0x44] sm:$0xf0]  ;;  %v627_v6 = vld [vmem:[#allocation2 + $0x30] sm:$0xf]  ;;  %v680_v7 = vld [vmem:[#allocation2 + $0x34] sm:$0xf0] }
  0x12   :  { %783 = vmatpush.bf16.msra.mxu2 %v660_v53  ;;  %198 = vmatpush.bf16.msra.mxu0 %v660_v53  ;;  %v636_v5 = vor.u32 %v682_v4, %v635_v3  ;;  %v628_v8 = vor.u32 %v680_v7, %v627_v6  ;;  %v619_v13 = vld [vmem:[#allocation2 + $0x20] sm:$0xf]  ;;  %v611_v16 = vld [vmem:[#allocation2 + $0x10] sm:$0xf]  ;;  %v674_v22 = vld [vmem:[#allocation2 + $0x4] sm:$0xf0] }
  0x13   :  { %v603_v21 = vld [vmem:[#allocation2] sm:$0xf]  ;;  %v66_v60 = vperm.slane %v969_v35, 0 }
  0x14   :  { %v604_v24 = vor.u32 %v674_v22, %v603_v21 }
  0x15   :  { %250 = vmatpush.bf16.msra.mxu1 %v640_v14  ;;  %794 = vmatpush.bf16.msra.mxu3 %v640_v14  ;;  %v678_v14 = vld [vmem:[#allocation2 + $0x24] sm:$0xf0] }
  0x16   :  { %784 = vmatpush.bf16.msra.mxu2 %v652_v59  ;;  %199 = vmatpush.bf16.msra.mxu0 %v652_v59  ;;  %v620_v15 = vor.u32 %v678_v14, %v619_v13 }
  0x19   :  { %251 = vmatpush.bf16.msra.mxu1 %v632_v17  ;;  %795 = vmatpush.bf16.msra.mxu3 %v632_v17  ;;  %v676_v17 = vld [vmem:[#allocation2 + $0x14] sm:$0xf0] }
  0x1a   :  { %785 = vmatpush.bf16.msra.mxu2 %v644_v62  ;;  %200 = vmatpush.bf16.msra.mxu0 %v644_v62  ;;  %v612_v18 = vor.u32 %v676_v17, %v611_v16 }
  0x1d   :  { %252 = vmatpush.bf16.msra.mxu1 %v624_v20  ;;  %796 = vmatpush.bf16.msra.mxu3 %v624_v20 }
  0x1e   :  { %786 = vmatpush.bf16.msra.mxu2 %v636_v5  ;;  %201 = vmatpush.bf16.msra.mxu0 %v636_v5 }
  0x21   :  { %253 = vmatpush.bf16.msra.mxu1 %v616_v23  ;;  %797 = vmatpush.bf16.msra.mxu3 %v616_v23 }
  0x22   :  { %787 = vmatpush.bf16.msra.mxu2 %v628_v8  ;;  %202 = vmatpush.bf16.msra.mxu0 %v628_v8 }
  0x25   :  { %254 = vmatpush.bf16.msra.mxu1 %v608_v26  ;;  %798 = vmatpush.bf16.msra.mxu3 %v608_v26 }
  0x26   :  { %788 = vmatpush.bf16.msra.mxu2 %v620_v15  ;;  %203 = vmatpush.bf16.msra.mxu0 %v620_v15 }
  0x28   :  { %255 = vmatmul.bf16.vlgmr.msra.gmra.mxu1 %v921_v27  ;;  %275 = vmatmul.bf16.vlgmr.msra.gmra.mxu3 %v933_v29 }
  0x2a   :  { %789 = vmatpush.bf16.msra.mxu2 %v612_v18  ;;  %204 = vmatpush.bf16.msra.mxu0 %v612_v18 }
  0x2e   :  { %790 = vmatpush.bf16.msra.mxu2 %v604_v24  ;;  %205 = vmatpush.bf16.msra.mxu0 %v604_v24 }
  0x31   :  { %226 = vmatmul.bf16.vlgmr.msra.gmra.mxu2 %v933_v29  ;;  %206 = vmatmul.bf16.vlgmr.msra.gmra.mxu0 %v921_v27 }
  0x38   :  { %260 = vmatmul.bf16.gmra.mxu1 %v927_v28  ;;  %280 = vmatmul.bf16.gmra.mxu3 %v944_v31 }
  0x41   :  { %231 = vmatmul.bf16.gmra.mxu2 %v944_v31  ;;  %211 = vmatmul.bf16.gmra.mxu0 %v927_v28 }
  0x48   :  { %265 = vmatmul.bf16.gmra.mxu1 %v939_v30  ;;  %285 = vmatmul.bf16.gmra.mxu3 %v956_v33 }
  0x51   :  { %236 = vmatmul.bf16.gmra.mxu2 %v956_v33  ;;  %216 = vmatmul.bf16.gmra.mxu0 %v939_v30  ;;  %v328_v30 = vlaneseq }
  0x53   :  { %v998_v51 = vand.u32 127, %v328_v30  ;;  %v329_v58 = vshrl.u32 %v328_v30, 7 }
  0x55   :  { %vm511_vm0 = vcmp.lt.s32.totalorder %v998_v51, 12  ;;  %v333_v62 = vadd.s32 32, %v329_v58  ;;  %v330_v5 = vadd.s32 8, %v329_v58  ;;  %vm365_vm2 = vcmp.eq.s32.totalorder %v998_v51, 32 }
  0x57   :  { %vm483_vm1 = vcmp.eq.s32.totalorder %v333_v62, 32  ;;  %vm383_vm3 = vcmp.lt.s32.totalorder %v330_v5, 12 }
  0x58   :  { %270 = vmatmul.bf16.gmra.mxu1 %v951_v32  ;;  %290 = vmatmul.bf16.gmra.mxu3 %v963_v34 }
  0x61   :  { %241 = vmatmul.bf16.gmra.mxu2 %v963_v34  ;;  %221 = vmatmul.bf16.gmra.mxu0 %v951_v32 }
  0xa5   :  { %v256_v37 = vpop.f32.mrf.mxu1 }
  0xa6   :  { %v257_v38 = vadd.f32 %v256_v37, %v972_v36 }
  0xa8   :  { %803 = vtanh.f32 %v257_v38 }
  0xab   :  { %v276_v63 = vpop.f32.mrf.mxu3 }
  0xac   :  { %v277_v19 = vadd.f32 %v276_v63, %v972_v36 }
  0xad   :  { %v258_v39 = vpop.f32.mrf.mxu1 }
  0xae   :  { %v804_v40 = vpop.eup %803  ;;  %v259_v41 = vadd.f32 %v258_v39, %v972_v36  ;;  %v207_v59 = vpop.f32.mrf.mxu0 }
  0xaf   :  { %446 = vxpose.xlu0.b32.start [1/16] %v804_v40, 128  ;;  %v208_v63 = vadd.f32 %v207_v59, %v66_v60 }
  0xb0   :  { %805 = vtanh.f32 %v259_v41 }
  0xb3   :  { %v278_v10 = vpop.f32.mrf.mxu3 }
  0xb4   :  { %v279_v26 = vadd.f32 %v278_v10, %v972_v36  ;;  %v227_v61 = vpop.f32.mrf.mxu2 }
  0xb5   :  { %v261_v42 = vpop.f32.mrf.mxu1 }
  0xb6   :  { %v806_v43 = vpop.eup %805  ;;  %v262_v44 = vadd.f32 %v261_v42, %v972_v36 }
  0xb7   :  { %447 = vxpose.xlu0.b32.cont [2/16] %v806_v43, 128 }
  0xb8   :  { %807 = vtanh.f32 %v262_v44 }
  0xbb   :  { %v281_v23 = vpop.f32.mrf.mxu3 }
  0xbc   :  { %v282_v38 = vadd.f32 %v281_v23, %v972_v36  ;;  %v229_v3 = vpop.f32.mrf.mxu2 }
  0xbd   :  { %v263_v45 = vpop.f32.mrf.mxu1 }
  0xbe   :  { %v808_v46 = vpop.eup %807  ;;  %v264_v47 = vadd.f32 %v263_v45, %v972_v36 }
  0xbf   :  { %448 = vxpose.xlu0.b32.cont [3/16] %v808_v46, 128 }
  0xc0   :  { %809 = vtanh.f32 %v264_v47 }
  0xc3   :  { %v283_v37 = vpop.f32.mrf.mxu3 }
  0xc4   :  { %v284_v42 = vadd.f32 %v283_v37, %v972_v36  ;;  %v232_v13 = vpop.f32.mrf.mxu2 }
  0xc5   :  { %v266_v48 = vpop.f32.mrf.mxu1 }
  0xc6   :  { %v810_v49 = vpop.eup %809  ;;  %v267_v50 = vadd.f32 %v266_v48, %v972_v36 }
  0xc7   :  { %449 = vxpose.xlu0.b32.cont [4/16] %v810_v49, 128 }
  0xc8   :  { %811 = vtanh.f32 %v267_v50 }
  0xcb   :  { %v286_v40 = vpop.f32.mrf.mxu3 }
  0xcc   :  { %v287_v27 = vadd.f32 %v286_v40, %v972_v36 }
  0xcd   :  { %v268_v54 = vpop.f32.mrf.mxu1 }
  0xce   :  { %v812_v55 = vpop.eup %811  ;;  %v269_v56 = vadd.f32 %v268_v54, %v972_v36 }
  0xcf   :  { %450 = vxpose.xlu0.b32.cont [5/16] %v812_v55, 128 }
  0xd0   :  { %813 = vtanh.f32 %v269_v56 }
  0xd3   :  { %v288_v29 = vpop.f32.mrf.mxu3 }
  0xd4   :  { %v289_v45 = vadd.f32 %v288_v29, %v972_v36 }
  0xd5   :  { %v271_v0 = vpop.f32.mrf.mxu1 }
  0xd6   :  { %v814_v1 = vpop.eup %813  ;;  %v272_v2 = vadd.f32 %v271_v0, %v972_v36 }
  0xd7   :  { %451 = vxpose.xlu0.b32.cont [6/16] %v814_v1, 128  ;;  %v209_v1 = vpop.f32.mrf.mxu0 }
  0xd8   :  { %815 = vtanh.f32 %v272_v2  ;;  %v210_v2 = vadd.f32 %v209_v1, %v66_v60 }
  0xdb   :  { %v291_v46 = vpop.f32.mrf.mxu3 }
  0xdc   :  { %v292_v28 = vadd.f32 %v291_v46, %v972_v36 }
  0xdd   :  { %v273_v9 = vpop.f32.mrf.mxu1 }
  0xde   :  { %v816_v11 = vpop.eup %815  ;;  %v274_v12 = vadd.f32 %v273_v9, %v972_v36 }
  0xdf   :  { %452 = vxpose.xlu0.b32.cont [7/16] %v816_v11, 128  ;;  %v212_v10 = vpop.f32.mrf.mxu0 }
  0xe0   :  { %817 = vtanh.f32 %v274_v12 }
  0xe1   :  { %819 = vtanh.f32 %v277_v19  ;;  %v234_v19 = vpop.f32.mrf.mxu2 }
  0xe2   :  { %821 = vtanh.f32 %v279_v26 }
  0xe3   :  { %823 = vtanh.f32 %v282_v38  ;;  %v293_v47 = vpop.f32.mrf.mxu3 }
  0xe4   :  { %825 = vtanh.f32 %v284_v42  ;;  %v294_v49 = vadd.f32 %v293_v47, %v972_v36 }
  0xe5   :  { %827 = vtanh.f32 %v287_v27 }
  0xe6   :  { %v818_v20 = vpop.eup %817  ;;  %829 = vtanh.f32 %v289_v45 }
  0xe7   :  { %453 = vxpose.xlu0.b32.cont [8/16] %v818_v20, 128  ;;  %v820_v25 = vpop.eup %819  ;;  %831 = vtanh.f32 %v292_v28  ;;  %v214_v18 = vpop.f32.mrf.mxu0 }
  0xe8   :  { %v822_v39 = vpop.eup %821  ;;  %833 = vtanh.f32 %v294_v49 }
  0xe9   :  { %v824_v41 = vpop.eup %823  ;;  %835 = vtanh.f32 %v208_v63 }
  0xea   :  { %v826_v43 = vpop.eup %825  ;;  %837 = vtanh.f32 %v210_v2 }
  0xeb   :  { %v828_v44 = vpop.eup %827 }
  0xec   :  { %v830_v31 = vpop.eup %829 }
  0xed   :  { %v832_v48 = vpop.eup %831 }
  0xee   :  { %v834_v33 = vpop.eup %833 }
  0xef   :  { %454 = vxpose.xlu0.b32.cont [9/16] %v820_v25, 128  ;;  %v836_v7 = vpop.eup %835  ;;  %v217_v24 = vpop.f32.mrf.mxu0 }
  0xf0   :  { %v838_v11 = vpop.eup %837  ;;  %v366_v12 = vsel %vm365_vm2, 1.0, %v836_v7  ;;  %v237_v25 = vpop.f32.mrf.mxu2 }
  0xf1   :  { %v367_v14 = vsel %vm365_vm2, 1.0, %v838_v11 }
  0xf2   :  { %v399_v15 = vsel %vm383_vm3, %v367_v14, 0.0 }
  0xf3   :  { %v692_v16 = vpack.c.bf16 %v399_v15, %v366_v12 }
  0xf5   :  { %693 = vst [vmem:[%s1065_s3] sm:$0xff] %v692_v16  }
  0xf7   :  { %455 = vxpose.xlu0.b32.cont [10/16] %v822_v39, 128  ;;  %v219_v37 = vpop.f32.mrf.mxu0 }
  0xf8   :  { %v239_v38 = vpop.f32.mrf.mxu2 }
  0xff   :  { %456 = vxpose.xlu0.b32.cont [11/16] %v824_v41, 128  ;;  %v222_v27 = vpop.f32.mrf.mxu0 }
 0x100   :  { %v242_v29 = vpop.f32.mrf.mxu2 }
 0x107   :  { %457 = vxpose.xlu0.b32.cont [12/16] %v826_v43, 128 }
 0x108   :  { %v244_v45 = vpop.f32.mrf.mxu2 }
 0x10f   :  { %458 = vxpose.xlu0.b32.cont [13/16] %v828_v44, 128  ;;  %v224_v44 = vpop.f32.mrf.mxu0 }
 0x117   :  { %459 = vxpose.xlu0.b32.cont [14/16] %v830_v31, 128 }
 0x11f   :  { %460 = vxpose.xlu0.b32.cont [15/16] %v832_v48, 128 }
 0x127   :  { %461 = vxpose.xlu0.b32.end [16/16] %v834_v33, 128 }
 0x153   :  { %v462_v50 = vpop.trf.xlu0 }
 0x154   :  { %v512_v53 = vsel %vm511_vm0, %v462_v50, 0.0 }
 0x15b   :  { %v463_v52 = vpop.trf.xlu0 }
 0x15c   :  { %v513_v36 = vsel %vm511_vm0, %v463_v52, 0.0 }
 0x15d   :  { %v732_v34 = vpack.c.bf16 %v513_v36, %v512_v53 }
 0x15f   :  { %733 = vst [vmem:[%s1066_s4] sm:$0xff] %v732_v34  }
 0x163   :  { %v464_v32 = vpop.trf.xlu0 }
 0x164   :  { %v514_v55 = vsel %vm511_vm0, %v464_v32, 0.0 }
 0x16b   :  { %v465_v54 = vpop.trf.xlu0 }
 0x16c   :  { %v515_v56 = vsel %vm511_vm0, %v465_v54, 0.0 }
 0x16d   :  { %v737_v57 = vpack.c.bf16 %v515_v56, %v514_v55 }
 0x16f   :  { %776 = vst [vmem:[%s1066_s4 + $0x8] sm:$0xff] %v737_v57  }
 0x173   :  { %v466_v0 = vpop.trf.xlu0 }
 0x174   :  { %v499_v4 = vsel %vm483_vm1, 1.0, %v466_v0 }
 0x175   :  { %v516_v8 = vsel %vm511_vm0, %v499_v4, 0.0 }
 0x17b   :  { %v467_v6 = vpop.trf.xlu0 }
 0x17c   :  { %v517_v35 = vsel %vm511_vm0, %v467_v6, 0.0 }
 0x17d   :  { %v742_v9 = vpack.c.bf16 %v517_v35, %v516_v8 }
 0x17f   :  { %777 = vst [vmem:[%s1066_s4 + $0x10] sm:$0xff] %v742_v9  }
 0x183   :  { %v468_v17 = vpop.trf.xlu0 }
 0x184   :  { %v518_v21 = vsel %vm511_vm0, %v468_v17, 0.0 }
 0x18b   :  { %v469_v20 = vpop.trf.xlu0 }
 0x18c   :  { %v519_v22 = vsel %vm511_vm0, %v469_v20, 0.0 }
 0x18d   :  { %v747_v23 = vpack.c.bf16 %v519_v22, %v518_v21 }
 0x18f   :  { %778 = vst [vmem:[%s1066_s4 + $0x18] sm:$0xff] %v747_v23  }
 0x193   :  { %v470_v26 = vpop.trf.xlu0 }
 0x194   :  { %v520_v40 = vsel %vm511_vm0, %v470_v26, 0.0 }
 0x19b   :  { %v471_v39 = vpop.trf.xlu0 }
 0x19c   :  { %v521_v41 = vsel %vm511_vm0, %v471_v39, 0.0 }
 0x19d   :  { %v752_v42 = vpack.c.bf16 %v521_v41, %v520_v40 }
 0x19f   :  { %779 = vst [vmem:[%s1066_s4 + $0x20] sm:$0xff] %v752_v42  }
 0x1a3   :  { %v472_v43 = vpop.trf.xlu0 }
 0x1a4   :  { %v522_v28 = vsel %vm511_vm0, %v472_v43, 0.0 }
 0x1ab   :  { %v473_v46 = vpop.trf.xlu0 }
 0x1ac   :  { %v523_v31 = vsel %vm511_vm0, %v473_v46, 0.0 }
 0x1ad   :  { %v757_v47 = vpack.c.bf16 %v523_v31, %v522_v28 }
 0x1af   :  { %780 = vst [vmem:[%s1066_s4 + $0x28] sm:$0xff] %v757_v47  }
 0x1b3   :  { %v474_v48 = vpop.trf.xlu0 }
 0x1b4   :  { %v524_v33 = vsel %vm511_vm0, %v474_v48, 0.0 }
 0x1bb   :  { %v475_v49 = vpop.trf.xlu0 }
 0x1bc   :  { %v525_v30 = vsel %vm511_vm0, %v475_v49, 0.0 }
 0x1bd   :  { %v762_v50 = vpack.c.bf16 %v525_v30, %v524_v33 }
 0x1bf   :  { %781 = vst [vmem:[%s1066_s4 + $0x30] sm:$0xff] %v762_v50  }
 0x1c3   :  { %v476_v52 = vpop.trf.xlu0 }
 0x1c4   :  { %v526_v36 = vsel %vm511_vm0, %v476_v52, 0.0 }
 0x1cb   :  { %v477_v53 = vpop.trf.xlu0 }
 0x1cc   :  { %v527_v34 = vsel %vm511_vm0, %v477_v53, 0.0 }
 0x1cd   :  { %v767_v32 = vpack.c.bf16 %v527_v34, %v526_v36 }
 0x1cf   :  { %782 = vst [vmem:[%s1066_s4 + $0x38] sm:$0xff] %v767_v32  }
 0x1d0   :  { %568 = vsyncpa [#allocation3], 1 }

// kernel: biaffine_ner_forward.3
= control target key start
LH: loop header
LB: loop body
LE: loop exit
PB: predicated region body
PF: predicated region fallthrough
CT: control target
= control target key end

     0   :  { %9 = vsyncpa [#allocation4], 0  ;;  %s2134_s15 = smov 0   ;;  %s2136_s16 = smov 0   ;;  %s2925_s0 = inlined_call_operand.vmem [shape: bf16[128,128], index: 0, kind: input, shape index: {}]   ;;  %s2926_s1 = inlined_call_operand.vmem [shape: bf16[128,128], index: 1, kind: input, shape index: {}]   ;;  %s2927_s2 = inlined_call_operand.hbm [shape: bf16[128,512], index: 2, kind: input, shape index: {}]   ;;  %s2928_s3 = inlined_call_operand.vmem [shape: s32[128,128], index: 3, kind: input, shape index: {}]   ;;  %s2929_s4 = inlined_call_operand.vmem [shape: f32[2,1,8,128], index: 4, kind: output, shape index: {}]  }
   0x1   :  { %s2138_s17 = smov 0  }
   0x2 LB: > { %s1568_s18 = sadd.s32 4294967295, %s2102_s17   ;;  %s27_s19 = sadd.s32 1, %s2098_s16  ;;  %s2102_s17 = sphi %s2138_s17, %s15_s17   ;;  %s2098_s16 = sphi %s2136_s16, %s2999_s16   ;;  %s2094_s15 = sphi %s2134_s15, %s2998_s15  }
   0x3   : > { %p29_p0 = scmp.ge.s32.totalorder %s27_s19, 2  ;;  %p1570_p1 = scmp.ge.s32.totalorder %s2102_s17, 1 }
   0x4   : > { %p161_p2 = scmp.lt.s32.totalorder %s2102_s17, 3  ;;  %p1903_p4 = scmp.eq.s32.totalorder %s1568_s18, 0 }
   0x5   : > { %s3001_s19 = smov (%p29_p0, %s27_s19), 0  ;;  %s179_s22 = sshll.u32 %s2927_s2, 4  ;;  %s180_s22 = int_to_ptr.hbm [resolvable:$true] %s179_s22 }
   0x6   : > { %p162_p3 = pnand %p1570_p1, %p161_p2  ;;  %s2104_s23 = smov [#allocation3]  }
   0x7   : > { %s181_s24 = sshll.u32 %s2104_s23, 4  ;;  %s2105_s25 = smov 256   ;;  %s182_s24 = int_to_ptr.vmem [resolvable:$true] %s181_s24 }
   0x8   : > { %p1899_p5 = pneg %p162_p3  ;;  %s2106_s26 = smov 16  }
   0x9   : > { %218 = sbr.rel (%p162_p3) target bundleno = 635 (0x27b), region = 36 }
   0xa   : > { %p1900_p6 = pnand %p1903_p4, %p1899_p5 }
   0xc   : > { %1902 = dma.hbm_to_vmem [thread:$0]  (!%p1900_p6), %s180_s22, 4096, %s182_s24, [#allocation4], %s2105_s25, %s2105_s25, %s2106_s26  }
   0xe   : > { %2089 = dma.done.wait (%p1903_p4), [#allocation4], 4096  }
   0xf   : > { %2091 = vsyncadd (%p1903_p4), [#allocation4], 4294963200  ;;  %v1711_v0 = vld [vmem:[#allocation3 + $0xe0] sm:$0xf]  ;;  %v1865_v1 = vld [vmem:[#allocation3 + $0xec] sm:$0xf0] }
  0x10   : > { %v1863_v2 = vld [vmem:[#allocation3 + $0xe4] sm:$0xf]  ;;  %v1712_v3 = vor.u32 %v1865_v1, %v1711_v0  ;;  %v1713_v4 = vld [vmem:[#allocation3 + $0xf0] sm:$0xf0]  ;;  %v1719_v5 = vld [vmem:[#allocation3 + $0xe8] sm:$0xf] }
  0x11   : > { %v1866_v6 = vld [vmem:[#allocation3 + $0xf4] sm:$0xf0]  ;;  %v1716_v7 = vor.u32 %v1863_v2, %v1713_v4  ;;  %v1864_v9 = vld [vmem:[#allocation3 + $0xec] sm:$0xf]  ;;  %v1721_v10 = vld [vmem:[#allocation3 + $0xf8] sm:$0xf0] }
  0x12   : > { %v1720_v8 = vor.u32 %v1866_v6, %v1719_v5  ;;  %v1695_v11 = vld [vmem:[#allocation3 + $0xc0] sm:$0xf]  ;;  %513 = vmatpush.bf16.msra.mxu0 %v1712_v3  ;;  %v1724_v12 = vor.u32 %v1864_v9, %v1721_v10  ;;  %v1861_v13 = vld [vmem:[#allocation3 + $0xcc] sm:$0xf0]  ;;  %v1859_v14 = vld [vmem:[#allocation3 + $0xc4] sm:$0xf] }
  0x13   : > { %v1697_v15 = vld [vmem:[#allocation3 + $0xd0] sm:$0xf0]  ;;  %542 = vmatpush.bf16.msra.mxu1 %v1716_v7  ;;  %v1696_v16 = vor.u32 %v1861_v13, %v1695_v11  ;;  %v1703_v18 = vld [vmem:[#allocation3 + $0xc8] sm:$0xf]  ;;  %v1862_v19 = vld [vmem:[#allocation3 + $0xd4] sm:$0xf0] }
  0x14   : > { %571 = vmatpush.bf16.msra.mxu2 %v1720_v8  ;;  %v1700_v17 = vor.u32 %v1859_v14, %v1697_v15  ;;  %v1860_v20 = vld [vmem:[#allocation3 + $0xcc] sm:$0xf]  ;;  %600 = vmatpush.bf16.msra.mxu3 %v1724_v12  ;;  %v1704_v21 = vor.u32 %v1862_v19, %v1703_v18  ;;  %v1705_v22 = vld [vmem:[#allocation3 + $0xd8] sm:$0xf0]  ;;  %v1679_v23 = vld [vmem:[#allocation3 + $0xa0] sm:$0xf] }
  0x15   : > { %v1857_v24 = vld [vmem:[#allocation3 + $0xac] sm:$0xf0]  ;;  %v1708_v25 = vor.u32 %v1860_v20, %v1705_v22  ;;  %v1855_v26 = vld [vmem:[#allocation3 + $0xa4] sm:$0xf]  ;;  %v1681_v27 = vld [vmem:[#allocation3 + $0xb0] sm:$0xf0] }
  0x16   : > { %v1687_v28 = vld [vmem:[#allocation3 + $0xa8] sm:$0xf]  ;;  %514 = vmatpush.bf16.msra.mxu0 %v1696_v16  ;;  %v1680_v29 = vor.u32 %v1857_v24, %v1679_v23  ;;  %v1858_v30 = vld [vmem:[#allocation3 + $0xb4] sm:$0xf0]  ;;  %v1856_v31 = vld [vmem:[#allocation3 + $0xac] sm:$0xf]  ;;  %v1684_v33 = vor.u32 %v1855_v26, %v1681_v27 }
  0x17   : > { %v1689_v32 = vld [vmem:[#allocation3 + $0xb8] sm:$0xf0]  ;;  %543 = vmatpush.bf16.msra.mxu1 %v1700_v17  ;;  %v1688_v34 = vor.u32 %v1858_v30, %v1687_v28  ;;  %v1663_v35 = vld [vmem:[#allocation3 + $0x80] sm:$0xf]  ;;  %v1853_v36 = vld [vmem:[#allocation3 + $0x8c] sm:$0xf0] }
  0x18   : > { %572 = vmatpush.bf16.msra.mxu2 %v1704_v21  ;;  %v1851_v37 = vld [vmem:[#allocation3 + $0x84] sm:$0xf]  ;;  %601 = vmatpush.bf16.msra.mxu3 %v1708_v25  ;;  %v1692_v38 = vor.u32 %v1856_v31, %v1689_v32  ;;  %v1665_v39 = vld [vmem:[#allocation3 + $0x90] sm:$0xf0]  ;;  %v1671_v40 = vld [vmem:[#allocation3 + $0x88] sm:$0xf]  ;;  %v1664_v44 = vor.u32 %v1853_v36, %v1663_v35 }
  0x19   : > { %v1854_v41 = vld [vmem:[#allocation3 + $0x94] sm:$0xf0]  ;;  %v1852_v42 = vld [vmem:[#allocation3 + $0x8c] sm:$0xf]  ;;  %v1673_v43 = vld [vmem:[#allocation3 + $0x98] sm:$0xf0]  ;;  %v1668_v45 = vor.u32 %v1851_v37, %v1665_v39 }
  0x1a   : > { %515 = vmatpush.bf16.msra.mxu0 %v1680_v29  ;;  %s1576_s27 = sshll.u32 %s2094_s15, 3  ;;  %v1672_v46 = vor.u32 %v1854_v41, %v1671_v40  ;;  %v1647_v47 = vld [vmem:[#allocation3 + $0x60] sm:$0xf]  ;;  %v1849_v48 = vld [vmem:[#allocation3 + $0x6c] sm:$0xf0]  ;;  %v1676_v50 = vor.u32 %v1852_v42, %v1673_v43  ;;  %v1872_v36 = vld [vmem:[%s2926_s1 + $0x28] sm:$0xff] }
  0x1b   : > { %544 = vmatpush.bf16.msra.mxu1 %v1684_v33  ;;  %v1847_v49 = vld [vmem:[#allocation3 + $0x64] sm:$0xf]  ;;  %v1649_v51 = vld [vmem:[#allocation3 + $0x70] sm:$0xf0]  ;;  %v1655_v52 = vld [vmem:[#allocation3 + $0x68] sm:$0xf]  ;;  %v1648_v56 = vor.u32 %v1849_v48, %v1647_v47 }
  0x1c   : > { %573 = vmatpush.bf16.msra.mxu2 %v1688_v34  ;;  %602 = vmatpush.bf16.msra.mxu3 %v1692_v38  ;;  %v1850_v53 = vld [vmem:[#allocation3 + $0x74] sm:$0xf0]  ;;  %v1848_v54 = vld [vmem:[#allocation3 + $0x6c] sm:$0xf]  ;;  %v1657_v55 = vld [vmem:[#allocation3 + $0x78] sm:$0xf0]  ;;  %v1652_v57 = vor.u32 %v1847_v49, %v1649_v51 }
  0x1d   : > { %p2161_p7 = scmp.lt.s32.totalorder %s1576_s27, 15  ;;  %v1656_v58 = vor.u32 %v1850_v53, %v1655_v52  ;;  %v1631_v59 = vld [vmem:[#allocation3 + $0x40] sm:$0xf]  ;;  %v1845_v60 = vld [vmem:[#allocation3 + $0x4c] sm:$0xf0]  ;;  %v1660_v62 = vor.u32 %v1848_v54, %v1657_v55  ;;  %v1874_v34 = vld [vmem:[%s2926_s1 + $0x38] sm:$0xff] }
  0x1e   : > { %516 = vmatpush.bf16.msra.mxu0 %v1664_v44  ;;  %v1843_v61 = vld [vmem:[#allocation3 + $0x44] sm:$0xf]  ;;  %v1633_v63 = vld [vmem:[#allocation3 + $0x50] sm:$0xf0]  ;;  %v1639_v0 = vld [vmem:[#allocation3 + $0x48] sm:$0xf]  ;;  %v1632_v4 = vor.u32 %v1845_v60, %v1631_v59 }
  0x1f   : > { %545 = vmatpush.bf16.msra.mxu1 %v1668_v45  ;;  %v1846_v1 = vld [vmem:[#allocation3 + $0x54] sm:$0xf0]  ;;  %v1844_v2 = vld [vmem:[#allocation3 + $0x4c] sm:$0xf]  ;;  %v1641_v3 = vld [vmem:[#allocation3 + $0x58] sm:$0xf0]  ;;  %v1636_v5 = vor.u32 %v1843_v61, %v1633_v63 }
  0x20   : > { %574 = vmatpush.bf16.msra.mxu2 %v1672_v46  ;;  %603 = vmatpush.bf16.msra.mxu3 %v1676_v50  ;;  %s3003_s27 = smov (!%p2161_p7, %s1576_s27), 15  ;;  %v1640_v6 = vor.u32 %v1846_v1, %v1639_v0  ;;  %v1615_v7 = vld [vmem:[#allocation3 + $0x20] sm:$0xf]  ;;  %v1841_v8 = vld [vmem:[#allocation3 + $0x2c] sm:$0xf0]  ;;  %v1644_v10 = vor.u32 %v1844_v2, %v1641_v3  ;;  %v1870_v39 = vld [vmem:[%s2926_s1 + $0x18] sm:$0xff] }
  0x21   : > { %v1839_v9 = vld [vmem:[#allocation3 + $0x24] sm:$0xf]  ;;  %v1617_v11 = vld [vmem:[#allocation3 + $0x30] sm:$0xf0]  ;;  %v1623_v12 = vld [vmem:[#allocation3 + $0x28] sm:$0xf]  ;;  %v1616_v16 = vor.u32 %v1841_v8, %v1615_v7 }
  0x22   : > { %517 = vmatpush.bf16.msra.mxu0 %v1648_v56  ;;  %v1842_v13 = vld [vmem:[#allocation3 + $0x34] sm:$0xf0]  ;;  %v1840_v14 = vld [vmem:[#allocation3 + $0x2c] sm:$0xf]  ;;  %v1625_v15 = vld [vmem:[#allocation3 + $0x38] sm:$0xf0]  ;;  %v1620_v17 = vor.u32 %v1839_v9, %v1617_v11 }
  0x23   : > { %546 = vmatpush.bf16.msra.mxu1 %v1652_v57  ;;  %s1577_s29 = sshll.u32 %s3003_s27, 2  ;;  %v1624_v18 = vor.u32 %v1842_v13, %v1623_v12  ;;  %v1599_v19 = vld [vmem:[#allocation3] sm:$0xf]  ;;  %v1837_v20 = vld [vmem:[#allocation3 + $0xc] sm:$0xf0]  ;;  %v1628_v22 = vor.u32 %v1840_v14, %v1625_v15  ;;  %v1868_v42 = vld [vmem:[%s2926_s1 + $0x8] sm:$0xff] }
  0x24   : > { %575 = vmatpush.bf16.msra.mxu2 %v1656_v58  ;;  %604 = vmatpush.bf16.msra.mxu3 %v1660_v62  ;;  %v1835_v21 = vld [vmem:[#allocation3 + $0x4] sm:$0xf]  ;;  %v1601_v23 = vld [vmem:[#allocation3 + $0x10] sm:$0xf0]  ;;  %v1607_v24 = vld [vmem:[#allocation3 + $0x8] sm:$0xf]  ;;  %v1600_v28 = vor.u32 %v1837_v20, %v1599_v19  ;;  %s2175_s6 = scalar_lea.vmem %s2925_s0, %s1577_s29 }
  0x25   : > { %v1838_v25 = vld [vmem:[#allocation3 + $0x14] sm:$0xf0]  ;;  %v1836_v26 = vld [vmem:[#allocation3 + $0xc] sm:$0xf]  ;;  %v1609_v27 = vld [vmem:[#allocation3 + $0x18] sm:$0xf0]  ;;  %v1604_v29 = vor.u32 %v1835_v21, %v1601_v23 }
  0x26   : > { %518 = vmatpush.bf16.msra.mxu0 %v1632_v4  ;;  %v1608_v30 = vor.u32 %v1838_v25, %v1607_v24  ;;  %v1612_v31 = vor.u32 %v1836_v26, %v1609_v27  ;;  %v1831_v32 = vld [vmem:[%s2175_s6] sm:$0xff]  ;;  %v1832_v33 = vld [vmem:[%s2175_s6 + $0x8] sm:$0xff]  ;;  %v1873_v35 = vld [vmem:[%s2926_s1 + $0x30] sm:$0xff]  ;;  %s1579_s28 = sshll.u32 %s3003_s27, 3  ;;  %p278_p8 = scmp.lt.s32.totalorder %s2094_s15, 1 }
  0x27   : > { %547 = vmatpush.bf16.msra.mxu1 %v1636_v5  ;;  %v1833_v37 = vld [vmem:[%s2175_s6 + $0x10] sm:$0xff]  ;;  %v1871_v38 = vld [vmem:[%s2926_s1 + $0x20] sm:$0xff]  ;;  %v1834_v40 = vld [vmem:[%s2175_s6 + $0x18] sm:$0xff]  ;;  %s2209_s5 = scalar_lea.vmem %s2928_s3, %s1579_s28 }
  0x28   : > { %576 = vmatpush.bf16.msra.mxu2 %v1640_v6  ;;  %605 = vmatpush.bf16.msra.mxu3 %v1644_v10  ;;  %v1869_v41 = vld [vmem:[%s2926_s1 + $0x10] sm:$0xff]  ;;  %v1867_v43 = vld [vmem:[%s2926_s1] sm:$0xff]  ;;  %s3005_s15 = smov (!%p278_p8, %s2094_s15), 1 }
  0x29   : > { %s1580_s27 = sshll.u32 %s3005_s15, 3 }
  0x2a   : > { %519 = vmatpush.bf16.msra.mxu0 %v1616_v16  ;;  %s284_s10 = scalar_lea.vmem %s2929_s4, %s1580_s27 }
  0x2b   : > { %548 = vmatpush.bf16.msra.mxu1 %v1620_v17 }
  0x2c   : > { %577 = vmatpush.bf16.msra.mxu2 %v1624_v18  ;;  %606 = vmatpush.bf16.msra.mxu3 %v1628_v22 }
  0x2e   : > { %520 = vmatpush.bf16.msra.mxu0 %v1600_v28 }
  0x2f   : > { %549 = vmatpush.bf16.msra.mxu1 %v1604_v29 }
  0x30   : > { %578 = vmatpush.bf16.msra.mxu2 %v1608_v30  ;;  %607 = vmatpush.bf16.msra.mxu3 %v1612_v31 }
  0x31   : > { %521 = vmatmul.bf16.vlgmr.msra.gmra.mxu0 %v1831_v32 }
  0x32   : > { %550 = vmatmul.bf16.vlgmr.msra.gmra.mxu1 %v1831_v32  ;;  %789 = vmatpush.bf16.msrb.mxu0 %v1874_v34 }
  0x33   : > { %579 = vmatmul.bf16.vlgmr.msra.gmra.mxu2 %v1831_v32  ;;  %608 = vmatmul.bf16.vlgmr.msra.gmra.mxu3 %v1831_v32 }
  0x34   : > { %1031 = vmatpush.bf16.msrb.mxu2 %v1874_v34  ;;  %866 = vmatpush.bf16.msrb.mxu1 %v1874_v34 }
  0x35   : > { %1204 = vmatpush.bf16.msrb.mxu3 %v1874_v34 }
  0x36   : > { %790 = vmatpush.bf16.msrb.mxu0 %v1873_v35 }
  0x38   : > { %1032 = vmatpush.bf16.msrb.mxu2 %v1873_v35  ;;  %867 = vmatpush.bf16.msrb.mxu1 %v1873_v35 }
  0x39   : > { %1205 = vmatpush.bf16.msrb.mxu3 %v1873_v35 }
  0x3a   : > { %791 = vmatpush.bf16.msrb.mxu0 %v1872_v36 }
  0x3c   : > { %1033 = vmatpush.bf16.msrb.mxu2 %v1872_v36  ;;  %868 = vmatpush.bf16.msrb.mxu1 %v1872_v36 }
  0x3d   : > { %1206 = vmatpush.bf16.msrb.mxu3 %v1872_v36 }
  0x3e   : > { %792 = vmatpush.bf16.msrb.mxu0 %v1871_v38 }
  0x40   : > { %1034 = vmatpush.bf16.msrb.mxu2 %v1871_v38  ;;  %869 = vmatpush.bf16.msrb.mxu1 %v1871_v38 }
  0x41   : > { %526 = vmatmul.bf16.gmra.mxu0 %v1832_v33  ;;  %1207 = vmatpush.bf16.msrb.mxu3 %v1871_v38 }
  0x42   : > { %555 = vmatmul.bf16.gmra.mxu1 %v1832_v33  ;;  %793 = vmatpush.bf16.msrb.mxu0 %v1870_v39 }
  0x43   : > { %584 = vmatmul.bf16.gmra.mxu2 %v1832_v33  ;;  %613 = vmatmul.bf16.gmra.mxu3 %v1832_v33 }
  0x44   : > { %1035 = vmatpush.bf16.msrb.mxu2 %v1870_v39  ;;  %870 = vmatpush.bf16.msrb.mxu1 %v1870_v39 }
  0x45   : > { %1208 = vmatpush.bf16.msrb.mxu3 %v1870_v39 }
  0x46   : > { %794 = vmatpush.bf16.msrb.mxu0 %v1869_v41 }
  0x48   : > { %1036 = vmatpush.bf16.msrb.mxu2 %v1869_v41  ;;  %871 = vmatpush.bf16.msrb.mxu1 %v1869_v41 }
  0x49   : > { %1209 = vmatpush.bf16.msrb.mxu3 %v1869_v41 }
  0x4a   : > { %795 = vmatpush.bf16.msrb.mxu0 %v1868_v42 }
  0x4c   : > { %1037 = vmatpush.bf16.msrb.mxu2 %v1868_v42  ;;  %872 = vmatpush.bf16.msrb.mxu1 %v1868_v42 }
  0x4d   : > { %1210 = vmatpush.bf16.msrb.mxu3 %v1868_v42 }
  0x4e   : > { %796 = vmatpush.bf16.msrb.mxu0 %v1867_v43 }
  0x50   : > { %873 = vmatpush.bf16.msrb.mxu1 %v1867_v43  ;;  %1038 = vmatpush.bf16.msrb.mxu2 %v1867_v43 }
  0x51   : > { %531 = vmatmul.bf16.gmra.mxu0 %v1833_v37  ;;  %1211 = vmatpush.bf16.msrb.mxu3 %v1867_v43 }
  0x52   : > { %560 = vmatmul.bf16.gmra.mxu1 %v1833_v37 }
  0x53   : > { %589 = vmatmul.bf16.gmra.mxu2 %v1833_v37  ;;  %618 = vmatmul.bf16.gmra.mxu3 %v1833_v37 }
  0x61   : > { %536 = vmatmul.bf16.gmra.mxu0 %v1834_v40 }
  0x62   : > { %565 = vmatmul.bf16.gmra.mxu1 %v1834_v40 }
  0x63   : > { %594 = vmatmul.bf16.gmra.mxu2 %v1834_v40  ;;  %623 = vmatmul.bf16.gmra.mxu3 %v1834_v40 }
  0xae   : > { %v522_v44 = vpop.f32.mrf.mxu0 }
  0xaf   : > { %v551_v45 = vpop.f32.mrf.mxu1 }
  0xb0   : > { %v629_v46 = vpack.c.bf16 %v551_v45, %v522_v44 }
  0xb2   : > { %645 = vst [vmem:[#allocation2] sm:$0xff] %v629_v46 }
  0xb6   : > { %v580_v47 = vpop.f32.mrf.mxu2  ;;  %v609_v48 = vpop.f32.mrf.mxu3 }
  0xb7   : > { %v524_v49 = vpop.f32.mrf.mxu0  ;;  %v630_v50 = vpack.c.bf16 %v609_v48, %v580_v47  ;;  %v553_v51 = vpop.f32.mrf.mxu1 }
  0xb8   : > { %v631_v52 = vpack.c.bf16 %v553_v51, %v524_v49 }
  0xb9   : > { %646 = vst [vmem:[#allocation2 + $0x8] sm:$0xff] %v630_v50  ;;  %v1735_v58 = vld [vmem:[#allocation2] sm:$0xf]  ;;  %v1783_v59 = vld [vmem:[#allocation2 + $0x4] sm:$0xf] }
  0xba   : > { %647 = vst [vmem:[#allocation2 + $0x10] sm:$0xff] %v631_v52 }
  0xbe   : > { %v582_v53 = vpop.f32.mrf.mxu2  ;;  %v611_v54 = vpop.f32.mrf.mxu3 }
  0xbf   : > { %v527_v55 = vpop.f32.mrf.mxu0  ;;  %v632_v56 = vpack.c.bf16 %v611_v54, %v582_v53  ;;  %v556_v57 = vpop.f32.mrf.mxu1 }
  0xc0   : > { %v633_v60 = vpack.c.bf16 %v556_v57, %v527_v55  ;;  %v1799_v6 = vld [vmem:[#allocation2 + $0x8] sm:$0xf]  ;;  %v1815_v9 = vld [vmem:[#allocation2 + $0xc] sm:$0xf] }
  0xc1   : > { %648 = vst [vmem:[#allocation2 + $0x18] sm:$0xff] %v632_v56  ;;  %v1875_v61 = vld [vmem:[#allocation2 + $0xc] sm:$0xf0]  ;;  %v1879_v62 = vld [vmem:[#allocation2 + $0x10] sm:$0xf0] }
  0xc2   : > { %649 = vst [vmem:[#allocation2 + $0x20] sm:$0xff] %v633_v60  ;;  %v1736_v63 = vor.u32 %v1875_v61, %v1735_v58  ;;  %v1784_v0 = vor.u32 %v1879_v62, %v1783_v59 }
  0xc4   : > { %797 = vmatmul.bf16.vlgmr.msrb.gmra.mxu0 %v1736_v63  ;;  %874 = vmatmul.bf16.vlgmr.msrb.gmra.mxu1 %v1784_v0 }
  0xc6   : > { %v585_v1 = vpop.f32.mrf.mxu2  ;;  %v614_v2 = vpop.f32.mrf.mxu3 }
  0xc7   : > { %v529_v3 = vpop.f32.mrf.mxu0  ;;  %v634_v4 = vpack.c.bf16 %v614_v2, %v585_v1  ;;  %v558_v5 = vpop.f32.mrf.mxu1 }
  0xc8   : > { %v635_v7 = vpack.c.bf16 %v558_v5, %v529_v3  ;;  %v1883_v8 = vld [vmem:[#allocation2 + $0x14] sm:$0xf0]  ;;  %v1887_v10 = vld [vmem:[#allocation2 + $0x18] sm:$0xf0] }
  0xc9   : > { %650 = vst [vmem:[#allocation2 + $0x28] sm:$0xff] %v634_v4  ;;  %v1800_v11 = vor.u32 %v1883_v8, %v1799_v6  ;;  %v1816_v12 = vor.u32 %v1887_v10, %v1815_v9  ;;  %v1739_v18 = vld [vmem:[#allocation2 + $0x20] sm:$0xf]  ;;  %v1787_v19 = vld [vmem:[#allocation2 + $0x24] sm:$0xf] }
  0xca   : > { %651 = vst [vmem:[#allocation2 + $0x30] sm:$0xff] %v635_v7 }
  0xcb   : > { %1039 = vmatmul.bf16.vlgmr.msrb.gmra.mxu2 %v1800_v11  ;;  %1212 = vmatmul.bf16.vlgmr.msrb.gmra.mxu3 %v1816_v12  ;;  %v2212_v12 = vld [vmem:[%s2209_s5] sm:$0xff] }
  0xcc   : > { %vm818_vm0 = vcmp.eq.s32.totalorder %v2212_v12, 0  ;;  %vm975_vm1 = vcmp.eq.s32.totalorder %v2212_v12, 1  ;;  %vm1148_vm3 = vcmp.eq.s32.totalorder %v2212_v12, 2  ;;  %vm1321_vm4 = vcmp.eq.s32.totalorder %v2212_v12, 3 }
  0xcd   : > { %vm685_vm14 = vcmp.ge.s32.totalorder %v2212_v12, 0 }
  0xce   : > { %v587_v13 = vpop.f32.mrf.mxu2  ;;  %v616_v14 = vpop.f32.mrf.mxu3 }
  0xcf   : > { %v532_v15 = vpop.f32.mrf.mxu0  ;;  %v636_v16 = vpack.c.bf16 %v616_v14, %v587_v13  ;;  %v561_v17 = vpop.f32.mrf.mxu1 }
  0xd0   : > { %v637_v20 = vpack.c.bf16 %v561_v17, %v532_v15  ;;  %v1803_v30 = vld [vmem:[#allocation2 + $0x28] sm:$0xf]  ;;  %v1819_v33 = vld [vmem:[#allocation2 + $0x2c] sm:$0xf] }
  0xd1   : > { %652 = vst [vmem:[#allocation2 + $0x38] sm:$0xff] %v636_v16  ;;  %v1876_v21 = vld [vmem:[#allocation2 + $0x2c] sm:$0xf0]  ;;  %v1880_v22 = vld [vmem:[#allocation2 + $0x30] sm:$0xf0] }
  0xd2   : > { %653 = vst [vmem:[#allocation2 + $0x40] sm:$0xff] %v637_v20  ;;  %v1740_v23 = vor.u32 %v1876_v21, %v1739_v18  ;;  %v1788_v24 = vor.u32 %v1880_v22, %v1787_v19 }
  0xd4   : > { %802 = vmatmul.bf16.gmra.mxu0 %v1740_v23  ;;  %879 = vmatmul.bf16.gmra.mxu1 %v1788_v24 }
  0xd6   : > { %v590_v25 = vpop.f32.mrf.mxu2  ;;  %v619_v26 = vpop.f32.mrf.mxu3 }
  0xd7   : > { %v534_v27 = vpop.f32.mrf.mxu0  ;;  %v638_v28 = vpack.c.bf16 %v619_v26, %v590_v25  ;;  %v563_v29 = vpop.f32.mrf.mxu1 }
  0xd8   : > { %v639_v31 = vpack.c.bf16 %v563_v29, %v534_v27  ;;  %v1884_v32 = vld [vmem:[#allocation2 + $0x34] sm:$0xf0]  ;;  %v1888_v34 = vld [vmem:[#allocation2 + $0x38] sm:$0xf0] }
  0xd9   : > { %654 = vst [vmem:[#allocation2 + $0x48] sm:$0xff] %v638_v28  ;;  %v1804_v35 = vor.u32 %v1884_v32, %v1803_v30  ;;  %v1820_v36 = vor.u32 %v1888_v34, %v1819_v33  ;;  %v1743_v42 = vld [vmem:[#allocation2 + $0x40] sm:$0xf]  ;;  %v1791_v43 = vld [vmem:[#allocation2 + $0x44] sm:$0xf] }
  0xda   : > { %655 = vst [vmem:[#allocation2 + $0x50] sm:$0xff] %v639_v31 }
  0xdb   : > { %1044 = vmatmul.bf16.gmra.mxu2 %v1804_v35  ;;  %1217 = vmatmul.bf16.gmra.mxu3 %v1820_v36 }
  0xde   : > { %v592_v37 = vpop.f32.mrf.mxu2  ;;  %v621_v38 = vpop.f32.mrf.mxu3 }
  0xdf   : > { %v537_v39 = vpop.f32.mrf.mxu0  ;;  %v640_v40 = vpack.c.bf16 %v621_v38, %v592_v37  ;;  %v566_v41 = vpop.f32.mrf.mxu1 }
  0xe0   : > { %v641_v44 = vpack.c.bf16 %v566_v41, %v537_v39  ;;  %v1807_v54 = vld [vmem:[#allocation2 + $0x48] sm:$0xf]  ;;  %v1823_v57 = vld [vmem:[#allocation2 + $0x4c] sm:$0xf] }
  0xe1   : > { %656 = vst [vmem:[#allocation2 + $0x58] sm:$0xff] %v640_v40  ;;  %v1877_v45 = vld [vmem:[#allocation2 + $0x4c] sm:$0xf0]  ;;  %v1881_v46 = vld [vmem:[#allocation2 + $0x50] sm:$0xf0] }
  0xe2   : > { %657 = vst [vmem:[#allocation2 + $0x60] sm:$0xff] %v641_v44  ;;  %v1744_v47 = vor.u32 %v1877_v45, %v1743_v42  ;;  %v1792_v48 = vor.u32 %v1881_v46, %v1791_v43 }
  0xe4   : > { %807 = vmatmul.bf16.gmra.mxu0 %v1744_v47  ;;  %884 = vmatmul.bf16.gmra.mxu1 %v1792_v48 }
  0xe6   : > { %v595_v49 = vpop.f32.mrf.mxu2  ;;  %v624_v50 = vpop.f32.mrf.mxu3 }
  0xe7   : > { %v539_v51 = vpop.f32.mrf.mxu0  ;;  %v642_v52 = vpack.c.bf16 %v624_v50, %v595_v49  ;;  %v568_v53 = vpop.f32.mrf.mxu1 }
  0xe8   : > { %v643_v55 = vpack.c.bf16 %v568_v53, %v539_v51  ;;  %v1885_v56 = vld [vmem:[#allocation2 + $0x54] sm:$0xf0]  ;;  %v1889_v58 = vld [vmem:[#allocation2 + $0x58] sm:$0xf0] }
  0xe9   : > { %658 = vst [vmem:[#allocation2 + $0x68] sm:$0xff] %v642_v52  ;;  %v1808_v59 = vor.u32 %v1885_v56, %v1807_v54  ;;  %v1824_v60 = vor.u32 %v1889_v58, %v1823_v57  ;;  %v1747_v0 = vld [vmem:[#allocation2 + $0x60] sm:$0xf]  ;;  %v1795_v1 = vld [vmem:[#allocation2 + $0x64] sm:$0xf] }
  0xea   : > { %659 = vst [vmem:[#allocation2 + $0x70] sm:$0xff] %v643_v55 }
  0xeb   : > { %1049 = vmatmul.bf16.gmra.mxu2 %v1808_v59  ;;  %1222 = vmatmul.bf16.gmra.mxu3 %v1824_v60 }
  0xee   : > { %v597_v61 = vpop.f32.mrf.mxu2  ;;  %v626_v62 = vpop.f32.mrf.mxu3 }
  0xef   : > { %v644_v63 = vpack.c.bf16 %v626_v62, %v597_v61 }
  0xf0   : > { %v1811_v6 = vld [vmem:[#allocation2 + $0x68] sm:$0xf]  ;;  %v1827_v8 = vld [vmem:[#allocation2 + $0x6c] sm:$0xf] }
  0xf1   : > { %660 = vst [vmem:[#allocation2 + $0x78] sm:$0xff] %v644_v63  ;;  %v1878_v2 = vld [vmem:[#allocation2 + $0x6c] sm:$0xf0]  ;;  %v1882_v3 = vld [vmem:[#allocation2 + $0x70] sm:$0xf0] }
  0xf2   : > { %v1748_v4 = vor.u32 %v1878_v2, %v1747_v0  ;;  %v1796_v5 = vor.u32 %v1882_v3, %v1795_v1 }
  0xf4   : > { %812 = vmatmul.bf16.gmra.mxu0 %v1748_v4  ;;  %889 = vmatmul.bf16.gmra.mxu1 %v1796_v5 }
  0xf8   : > { %v1886_v7 = vld [vmem:[#allocation2 + $0x74] sm:$0xf0]  ;;  %v1890_v9 = vld [vmem:[#allocation2 + $0x78] sm:$0xf0] }
  0xf9   : > { %v1812_v10 = vor.u32 %v1886_v7, %v1811_v6  ;;  %v1828_v11 = vor.u32 %v1890_v9, %v1827_v8 }
  0xfb   : > { %1054 = vmatmul.bf16.gmra.mxu2 %v1812_v10  ;;  %1227 = vmatmul.bf16.gmra.mxu3 %v1828_v11 }
 0x141   : > { %v2216_v13 = vpop.f32.mrf.mxu0  ;;  %v2218_v14 = vpop.f32.mrf.mxu1 }
 0x142   : > { %v826_v15 = vsel %vm818_vm0, %v2216_v13, 0.0  ;;  %vm895_vm2 = vcmp.gt.f32.partialorder %v2218_v14, %v2216_v13  ;;  %v983_v16 = vsel %vm975_vm1, %v2218_v14, 0.0 }
 0x143   : > { %v991_v17 = vadd.f32 %v983_v16, %v826_v15  ;;  %v2229_v18 = vsel %vm895_vm2, %v2218_v14, %v2216_v13  ;;  %v2342_v15 = vld [vmem:[%s2209_s5 + $0x8] sm:$0xff] }
 0x144   : > { %v919_v19 = vsub.f32 %v2216_v13, %v2229_v18  ;;  %v943_v20 = vsub.f32 %v2218_v14, %v2229_v18  ;;  %vm819_vm13 = vcmp.eq.s32.totalorder %v2342_v15, 0  ;;  %vm686_vm0 = vcmp.ge.s32.totalorder %v2342_v15, 0 }
 0x145   : > { %vm976_vm1 = vcmp.eq.s32.totalorder %v2342_v15, 1 }
 0x146   : > { %v927_v22 = vmul.f32 1.442695, %v919_v19  ;;  %v951_v24 = vmul.f32 1.442695, %v943_v20 }
 0x148   : > { %1934 = vpow2.f32 %v927_v22 }
 0x149   : > { %v2235_v21 = vpop.f32.mrf.mxu0  ;;  %v2237_v23 = vpop.f32.mrf.mxu1  ;;  %1936 = vpow2.f32 %v951_v24 }
 0x14a   : > { %vm896_vm5 = vcmp.gt.f32.partialorder %v2237_v23, %v2235_v21 }
 0x14b   : > { %v2267_v33 = vsel %vm896_vm5, %v2237_v23, %v2235_v21 }
 0x14c   : > { %v920_v40 = vsub.f32 %v2235_v21, %v2267_v33  ;;  %v944_v43 = vsub.f32 %v2237_v23, %v2267_v33 }
 0x14e   : > { %v2241_v25 = vpop.f32.mrf.mxu2  ;;  %v2243_v26 = vpop.f32.mrf.mxu3  ;;  %v929_v50 = vmul.f32 1.442695, %v920_v40  ;;  %v953_v53 = vmul.f32 1.442695, %v944_v43 }
 0x14f   : > { %vm1060_vm6 = vcmp.gt.f32.partialorder %v2241_v25, %v2229_v18  ;;  %v1156_v27 = vsel %vm1148_vm3, %v2241_v25, 0.0  ;;  %v1329_v28 = vsel %vm1321_vm4, %v2243_v26, 0.0  ;;  %v1935_v42 = vpop.eup %1934  ;;  %vm1149_vm3 = vcmp.eq.s32.totalorder %v2342_v15, 2 }
 0x150   : > { %v2256_v29 = vsel %vm1060_vm6, %v2241_v25, %v2229_v18  ;;  %v1164_v32 = vadd.f32 %v1156_v27, %v991_v17  ;;  %v1937_v47 = vpop.eup %1936 }
 0x151   : > { %v1084_v30 = vsub.f32 %v2229_v18, %v2256_v29  ;;  %v1116_v31 = vsub.f32 %v2241_v25, %v2256_v29  ;;  %vm1233_vm7 = vcmp.gt.f32.partialorder %v2243_v26, %v2256_v29  ;;  %v2286_v41 = vpop.f32.mrf.mxu0  ;;  %v2290_v45 = vpop.f32.mrf.mxu1  ;;  %v967_v52 = vadd.f32 %v1937_v47, %v1935_v42 }
 0x152   : > { %v2276_v36 = vsel %vm1233_vm7, %v2243_v26, %v2256_v29  ;;  %v2282_v39 = vadd.f32 %v1329_v28, %v1164_v32  ;;  %vm897_vm9 = vcmp.gt.f32.partialorder %v2290_v45, %v2286_v41  ;;  %v2364_v32 = vld [vmem:[%s2209_s5 + $0x10] sm:$0xff] }
 0x153   : > { %v1092_v34 = vmul.f32 1.442695, %v1084_v30  ;;  %v1124_v35 = vmul.f32 1.442695, %v1116_v31  ;;  %v1257_v37 = vsub.f32 %v2256_v29, %v2276_v36  ;;  %v1289_v38 = vsub.f32 %v2243_v26, %v2276_v36 }
 0x154   : > { %v2316_v59 = vsel %vm897_vm9, %v2290_v45, %v2286_v41  ;;  %vm820_vm4 = vcmp.eq.s32.totalorder %v2364_v32, 0 }
 0x155   : > { %1938 = vpow2.f32 %v1092_v34  ;;  %v1265_v44 = vmul.f32 1.442695, %v1257_v37  ;;  %v1297_v48 = vmul.f32 1.442695, %v1289_v38  ;;  %v921_v2 = vsub.f32 %v2286_v41, %v2316_v59 }
 0x156   : > { %v2292_v46 = vpop.f32.mrf.mxu2  ;;  %1940 = vpow2.f32 %v1124_v35  ;;  %v2307_v55 = vpop.f32.mrf.mxu3  ;;  %v945_v6 = vsub.f32 %v2290_v45, %v2316_v59  ;;  %v828_v25 = vsel %vm820_vm4, %v2286_v41, 0.0 }
 0x157   : > { %vm1061_vm8 = vcmp.gt.f32.partialorder %v2292_v46, %v2267_v33  ;;  %1942 = vpow2.f32 %v1265_v44  ;;  %v931_v16 = vmul.f32 1.442695, %v921_v2  ;;  %v2935_v44 = vmov 0.0  }
 0x158   : > { %v2301_v49 = vsel %vm1061_vm8, %v2292_v46, %v2267_v33  ;;  %1944 = vpow2.f32 %v1297_v48  ;;  %v955_v19 = vmul.f32 1.442695, %v945_v6  ;;  %v2384_v47 = vsel %vm685_vm14, 1.0, %v2935_v44 }
 0x159   : > { %v1085_v51 = vsub.f32 %v2267_v33, %v2301_v49  ;;  %vm2932_vm10 = vcmp.gt.f32.partialorder %v2307_v55, %v2301_v49  ;;  %1946 = vpow2.f32 %v929_v50  ;;  %v1117_v61 = vsub.f32 %v2292_v46, %v2301_v49  ;;  %v2327_v0 = vpop.f32.mrf.mxu0  ;;  %v2331_v3 = vpop.f32.mrf.mxu1 }
 0x15a   : > { %1948 = vpow2.f32 %v953_v53  ;;  %v2325_v63 = vsel %vm2932_vm10, %v2307_v55, %v2301_v49  ;;  %vm2930_vm12 = vcmp.gt.f32.partialorder %v2331_v3, %v2327_v0  ;;  %v2401_v53 = vsel %vm686_vm0, 1.0, %v2935_v44 }
 0x15b   : > { %v1939_v54 = vpop.eup %1938  ;;  %v1094_v57 = vmul.f32 1.442695, %v1085_v51  ;;  %v1126_v8 = vmul.f32 1.442695, %v1117_v61  ;;  %v1258_v9 = vsub.f32 %v2301_v49, %v2325_v63  ;;  %v1290_v27 = vsub.f32 %v2307_v55, %v2325_v63  ;;  %2958 = vst [vmem:[#allocation6_spill] sm:$0xff] %v2401_v53  ;;  %v2413_v61 = vld [vmem:[%s2209_s5 + $0x18] sm:$0xff] }
 0x15c   : > { %v1108_v56 = vmul.f32 %v1939_v54, %v967_v52  ;;  %v1941_v58 = vpop.eup %1940  ;;  %v2372_v35 = vsel %vm2930_vm12, %v2331_v3, %v2327_v0  ;;  %vm977_vm12 = vcmp.eq.s32.totalorder %v2364_v32, 1  ;;  %vm687_vm14 = vcmp.ge.s32.totalorder %v2364_v32, 0  ;;  %2959 = vst [vmem:[#allocation7_spill] sm:$0xff] %v2413_v61 }
 0x15d   : > { %v1943_v62 = vpop.eup %1942  ;;  %1950 = vpow2.f32 %v1094_v57  ;;  %v1267_v24 = vmul.f32 1.442695, %v1258_v9  ;;  %v1299_v38 = vmul.f32 1.442695, %v1290_v27  ;;  %v922_v54 = vsub.f32 %v2327_v0, %v2372_v35 }
 0x15e   : > { %v1140_v60 = vadd.f32 %v1941_v58, %v1108_v56  ;;  %v2333_v4 = vpop.f32.mrf.mxu2  ;;  %v1945_v5 = vpop.eup %1944  ;;  %v946_v58 = vsub.f32 %v2331_v3, %v2372_v35  ;;  %vm1322_vm0 = vcmp.eq.s32.totalorder %v2342_v15, 3  ;;  %v2933_v2 = vmov 0  }
 0x15f   : > { %v1947_v10 = vpop.eup %1946  ;;  %vm1062_vm11 = vcmp.gt.f32.partialorder %v2333_v4, %v2316_v59  ;;  %v2359_v30 = vpop.f32.mrf.mxu3  ;;  %v827_v6 = vsel %vm819_vm13, %v2235_v21, 0.0  ;;  %v933_v13 = vmul.f32 1.442695, %v922_v54  ;;  %vm978_vm13 = vcmp.eq.s32.totalorder %v2413_v61, 1 }
 0x160   : > { %v1281_v1 = vmul.f32 %v1943_v62, %v1140_v60  ;;  %v1949_v11 = vpop.eup %1948  ;;  %v2349_v17 = vsel %vm1062_vm11, %v2333_v4, %v2316_v59  ;;  %v1157_v21 = vsel %vm1149_vm3, %v2292_v46, 0.0 }
 0x161   : > { %v1086_v20 = vsub.f32 %v2316_v59, %v2349_v17  ;;  %v968_v28 = vadd.f32 %v1949_v11, %v1947_v10  ;;  %vm2931_vm15 = vcmp.gt.f32.partialorder %v2359_v30, %v2349_v17  ;;  %v1118_v40 = vsub.f32 %v2333_v4, %v2349_v17  ;;  %v2377_v42 = vpop.f32.mrf.mxu0  ;;  %v2379_v43 = vpop.f32.mrf.mxu1 }
 0x162   : > { %v1313_v7 = vadd.f32 %v1945_v5, %v1281_v1  ;;  %v2392_v50 = vsel %vm2931_vm15, %v2359_v30, %v2349_v17  ;;  %vm899_vm15 = vcmp.gt.f32.partialorder %v2379_v43, %v2377_v42  ;;  %v903_v5 = vsel %vm895_vm2, 1, %v2933_v2 }
 0x163   : > { %v1951_v22 = vpop.eup %1950  ;;  %v1096_v31 = vmul.f32 1.442695, %v1086_v20  ;;  %v1128_v62 = vmul.f32 1.442695, %v1118_v40  ;;  %v1259_v1 = vsub.f32 %v2349_v17, %v2392_v50  ;;  %v984_v10 = vsel %vm976_vm1, %v2237_v23, 0.0 }
 0x164   : > { %1952 = vlog2.f32 %v1313_v7  ;;  %v1109_v34 = vmul.f32 %v1951_v22, %v968_v28  ;;  %v2442_v14 = vsel %vm899_vm15, %v2379_v43, %v2377_v42  ;;  %vm821_vm2 = vcmp.eq.s32.totalorder %v2413_v61, 0 }
 0x165   : > { %1954 = vpow2.f32 %v1126_v8  ;;  %2961 = vst [vmem:[#allocation9_spill] sm:$0xff] %v2442_v14  ;;  %vm1150_vm1 = vcmp.eq.s32.totalorder %v2364_v32, 2  ;;  %v2455_v20 = vsel %vm687_vm14, 1.0, %v2935_v44  ;;  %v1269_v27 = vmul.f32 1.442695, %v1259_v1 }
 0x166   : > { %1956 = vpow2.f32 %v931_v16  ;;  %v2394_v51 = vpop.f32.mrf.mxu2  ;;  %v1291_v28 = vsub.f32 %v2359_v30, %v2392_v50  ;;  %v947_v23 = vsub.f32 %v2379_v43, %v2442_v14  ;;  %v985_v1 = vsel %vm977_vm12, %v2290_v45, 0.0 }
 0x167   : > { %1958 = vpow2.f32 %v955_v19  ;;  %vm1063_vm10 = vcmp.gt.f32.partialorder %v2394_v51, %v2372_v35  ;;  %v957_v19 = vmul.f32 1.442695, %v946_v58 }
 0x168   : > { %1960 = vpow2.f32 %v1267_v24  ;;  %v2432_v8 = vsel %vm1063_vm10, %v2394_v51, %v2372_v35  ;;  %v904_v24 = vsel %vm896_vm5, 1, %v2933_v2  ;;  %v1301_v58 = vmul.f32 1.442695, %v1291_v28 }
 0x169   : > { %1962 = vpow2.f32 %v1096_v31  ;;  %2960 = vst [vmem:[#allocation8_spill] sm:$0xff] %v2432_v8  ;;  %v2463_v31 = vpop.f32.mrf.mxu3  ;;  %vm1323_vm5 = vcmp.eq.s32.totalorder %v2364_v32, 3  ;;  %v2490_v18 = vpop.f32.mrf.mxu0 }
 0x16a   : > { %v1953_v37 = vpop.eup %1952  ;;  %1964 = vpow2.f32 %v1299_v38  ;;  %2962 = vst [vmem:[#allocation10_spill] sm:$0xff] %v2463_v31  ;;  %v923_v38 = vsub.f32 %v2377_v42, %v2442_v14  ;;  %vm1236_vm14 = vcmp.gt.f32.partialorder %v2463_v31, %v2432_v8 }
 0x16b   : > { %v1346_v48 = vmul.f32 0.6931472, %v1953_v37  ;;  %v1955_v52 = vpop.eup %1954  ;;  %1966 = vpow2.f32 %v1128_v62  ;;  %v2488_v62 = vsel %vm1236_vm14, %v2463_v31, %v2432_v8 }
 0x16c   : > { %v1141_v57 = vadd.f32 %v1955_v52, %v1109_v34  ;;  %v1957_v60 = vpop.eup %1956  ;;  %v992_v34 = vadd.f32 %v984_v10, %v827_v6  ;;  %1968 = vpow2.f32 %v933_v13  ;;  %v1068_v52 = vsel %vm1060_vm6, 2, %v903_v5  ;;  %v2498_v6 = vpop.f32.mrf.mxu1 }
 0x16d   : > { %v1361_v56 = vadd.f32 %v1346_v48, %v2276_v36  ;;  %v1959_v36 = vpop.eup %1958  ;;  %1970 = vpow2.f32 %v957_v19  ;;  %v935_v5 = vmul.f32 1.442695, %v923_v38  ;;  %v2505_v10 = vsel %vm1233_vm7, 3, %v1068_v52 }
 0x16e   : > { %v1961_v9 = vpop.eup %1960  ;;  %v969_v37 = vadd.f32 %v1959_v36, %v1957_v60  ;;  %1972 = vpow2.f32 %v1269_v27  ;;  %v1119_v60 = vsub.f32 %v2394_v51, %v2432_v8  ;;  %v1165_v36 = vadd.f32 %v1157_v21, %v992_v34 }
 0x16f   : > { %v1369_v7 = vsub.f32 %v1361_v56, %v2282_v39  ;;  %v1087_v39 = vsub.f32 %v2372_v35, %v2432_v8  ;;  %v1282_v16 = vmul.f32 %v1961_v9, %v1141_v57  ;;  %v1963_v22 = vpop.eup %1962  ;;  %v2478_v57 = vld [vmem:[%s2209_s5 + $0x20] sm:$0xff]  ;;  %v905_v13 = vsel %vm897_vm9, 1, %v2933_v2 }
 0x170   : > { %v1965_v40 = vpop.eup %1964  ;;  %v1110_v56 = vmul.f32 %v1963_v22, %v969_v37  ;;  %vm822_vm6 = vcmp.eq.s32.totalorder %v2478_v57, 0  ;;  %vm979_vm12 = vcmp.eq.s32.totalorder %v2478_v57, 1  ;;  %vm1151_vm7 = vcmp.eq.s32.totalorder %v2413_v61, 2 }
 0x171   : > { %v2447_v11 = vmul.f32 %v2384_v47, %v1369_v7  ;;  %v1098_v48 = vmul.f32 1.442695, %v1087_v39  ;;  %v1314_v54 = vadd.f32 %v1965_v40, %v1282_v16  ;;  %v2500_v7 = vpop.f32.mrf.mxu2  ;;  %v1967_v9 = vpop.eup %1966  ;;  %v959_v39 = vmul.f32 1.442695, %v947_v23 }
 0x172   : > { %v1330_v16 = vsel %vm1322_vm0, %v2307_v55, 0.0  ;;  %v1142_v19 = vadd.f32 %v1967_v9, %v1110_v56  ;;  %v1260_v26 = vsub.f32 %v2432_v8, %v2488_v62  ;;  %v1969_v29 = vpop.eup %1968  ;;  %v1130_v41 = vmul.f32 1.442695, %v1119_v60  ;;  %v2559_v56 = vpop.f32.mrf.mxu3 }
 0x173   : > { %1974 = vpow2.f32 %v1098_v48  ;;  %vm900_vm9 = vcmp.gt.f32.partialorder %v2498_v6, %v2490_v18  ;;  %vm1064_vm3 = vcmp.gt.f32.partialorder %v2500_v7, %v2442_v14  ;;  %v1971_v45 = vpop.eup %1970  ;;  %v993_v22 = vadd.f32 %v985_v1, %v828_v25  ;;  %2965 = vst [vmem:[#allocation13_spill] sm:$0xff] %v2559_v56 }
 0x174   : > { %1976 = vlog2.f32 %v1314_v54  ;;  %v2526_v27 = vsel %vm1061_vm8, 2, %v904_v24  ;;  %v2528_v28 = vadd.f32 %v1330_v16, %v1165_v36  ;;  %v1973_v34 = vpop.eup %1972  ;;  %v829_v37 = vsel %vm821_vm2, %v2327_v0, 0.0 }
 0x175   : > { %1978 = vpow2.f32 %v1301_v58  ;;  %v986_v38 = vsel %vm978_vm13, %v2331_v3, 0.0  ;;  %v1158_v40 = vsel %vm1150_vm1, %v2333_v4, 0.0  ;;  %v1283_v33 = vmul.f32 %v1973_v34, %v1142_v19 }
 0x176   : > { %1980 = vpow2.f32 %v935_v5  ;;  %v1271_v46 = vmul.f32 1.442695, %v1260_v26  ;;  %v2544_v24 = vsel %vm900_vm9, %v2498_v6, %v2490_v18  ;;  %v2551_v21 = vsel %vm1064_vm3, %v2500_v7, %v2442_v14 }
 0x177   : > { %1982 = vpow2.f32 %v959_v39  ;;  %2963 = vst [vmem:[#allocation11_spill] sm:$0xff] %v2544_v24  ;;  %v1292_v48 = vsub.f32 %v2463_v31, %v2488_v62  ;;  %v1088_v52 = vsub.f32 %v2442_v14, %v2551_v21  ;;  %v1120_v54 = vsub.f32 %v2500_v7, %v2551_v21 }
 0x178   : > { %2964 = vst [vmem:[#allocation12_spill] sm:$0xff] %v2551_v21  ;;  %1984 = vpow2.f32 %v1130_v41  ;;  %v970_v60 = vadd.f32 %v1971_v45, %v1969_v29  ;;  %v994_v25 = vadd.f32 %v986_v38, %v829_v37  ;;  %v2564_v1 = vsel %vm1062_vm11, 2, %v905_v13 }
 0x179   : > { %v1975_v23 = vpop.eup %1974  ;;  %vm1237_vm8 = vcmp.gt.f32.partialorder %v2559_v56, %v2551_v21  ;;  %v1166_v5 = vadd.f32 %v1158_v40, %v993_v22  ;;  %v924_v9 = vsub.f32 %v2490_v18, %v2544_v24  ;;  %v1100_v39 = vmul.f32 1.442695, %v1088_v52  ;;  %v2582_v22 = vpop.f32.mrf.mxu2 }
 0x17a   : > { %v1977_v58 = vpop.eup %1976  ;;  %v1132_v16 = vmul.f32 1.442695, %v1120_v54  ;;  %v1331_v29 = vsel %vm1323_vm5, %v2359_v30, 0.0  ;;  %v1111_v41 = vmul.f32 %v1975_v23, %v970_v60  ;;  %1986 = vpow2.f32 %v1271_v46  ;;  %2966 = vst [vmem:[#allocation14_spill] sm:$0xff] %v2582_v22  ;;  %v2599_v52 = vpop.f32.mrf.mxu0 }
 0x17b   : > { %v1979_v36 = vpop.eup %1978  ;;  %v1303_v4 = vmul.f32 1.442695, %v1292_v48  ;;  %v948_v13 = vsub.f32 %v2498_v6, %v2544_v24  ;;  %1988 = vpow2.f32 %v1100_v39  ;;  %v2580_v45 = vsel %vm1237_vm8, %v2559_v56, %v2551_v21  ;;  %v2601_v54 = vpop.f32.mrf.mxu1 }
 0x17c   : > { %v1981_v19 = vpop.eup %1980  ;;  %v1315_v26 = vadd.f32 %v1979_v36, %v1283_v33  ;;  %v830_v34 = vsel %vm822_vm6, %v2377_v42, 0.0  ;;  %v987_v37 = vsel %vm979_vm12, %v2379_v43, 0.0  ;;  %v1261_v38 = vsub.f32 %v2551_v21, %v2580_v45 }
 0x17d   : > { %v1983_v59 = vpop.eup %1982  ;;  %v1293_v40 = vsub.f32 %v2559_v56, %v2580_v45  ;;  %v2594_v46 = vadd.f32 %v1331_v29, %v1166_v5  ;;  %v1159_v23 = vsel %vm1151_vm7, %v2394_v51, 0.0  ;;  %v937_v48 = vmul.f32 1.442695, %v924_v9 }
 0x17e   : > { %v1985_v33 = vpop.eup %1984  ;;  %1990 = vpow2.f32 %v1132_v16  ;;  %v1273_v36 = vmul.f32 1.442695, %v1261_v38  ;;  %v2603_v2 = vadd.f32 %v987_v37, %v830_v34  ;;  %v961_v5 = vmul.f32 1.442695, %v948_v13 }
 0x17f   : > { %1992 = vlog2.f32 %v1315_v26  ;;  %v1143_v60 = vadd.f32 %v1985_v33, %v1111_v41  ;;  %v1305_v39 = vmul.f32 1.442695, %v1293_v40  ;;  %vm1065_vm11 = vcmp.gt.f32.partialorder %v2582_v22, %v2544_v24 }
 0x180   : > { %1994 = vpow2.f32 %v1303_v4  ;;  %v1987_v29 = vpop.eup %1986  ;;  %v1348_v44 = vmul.f32 0.6931472, %v1977_v58  ;;  %v971_v9 = vadd.f32 %v1983_v59, %v1981_v19  ;;  %vm901_vm4 = vcmp.gt.f32.partialorder %v2601_v54, %v2599_v52  ;;  %v2612_v4 = vld [vmem:[%s2209_s5 + $0x28] sm:$0xff]  ;;  %v2621_v19 = vpop.f32.mrf.mxu3 }
 0x181   : > { %1996 = vpow2.f32 %v1273_v36  ;;  %v1989_v16 = vpop.eup %1988  ;;  %v1167_v26 = vadd.f32 %v1159_v23, %v994_v25  ;;  %vm688_vm0 = vcmp.ge.s32.totalorder %v2413_v61, 0  ;;  %vm1324_vm2 = vcmp.eq.s32.totalorder %v2413_v61, 3 }
 0x182   : > { %1998 = vpow2.f32 %v937_v48  ;;  %v1284_v41 = vmul.f32 %v1987_v29, %v1143_v60  ;;  %v1112_v13 = vmul.f32 %v1989_v16, %v971_v9  ;;  %v2619_v58 = vsel %vm1065_vm11, %v2582_v22, %v2544_v24  ;;  %v2646_v29 = vpop.f32.mrf.mxu2 }
 0x183   : > { %2000 = vpow2.f32 %v1305_v39  ;;  %2967 = vst [vmem:[#allocation15_spill] sm:$0xff] %v2619_v58  ;;  %v2628_v59 = vsel %vm901_vm4, %v2601_v54, %v2599_v52  ;;  %v1089_v34 = vsub.f32 %v2544_v24, %v2619_v58  ;;  %v1121_v37 = vsub.f32 %v2582_v22, %v2619_v58 }
 0x184   : > { %v1991_v25 = vpop.eup %1990  ;;  %2002 = vpow2.f32 %v961_v5  ;;  %2968 = vst [vmem:[#allocation16_spill] sm:$0xff] %v2628_v59  ;;  %v1362_v40 = vadd.f32 %v1348_v44, %v2325_v63  ;;  %v2969_v33 = vmov 0.0   ;;  %vm1238_vm13 = vcmp.gt.f32.partialorder %v2621_v19, %v2619_v58 }
 0x185   : > { %v1993_v38 = vpop.eup %1992  ;;  %v2638_v23 = vsel %vm688_vm0, 1.0, %v2969_v33  ;;  %v1144_v48 = vadd.f32 %v1991_v25, %v1112_v13  ;;  %v1332_v36 = vsel %vm1324_vm2, %v2463_v31, 0.0  ;;  %vm823_vm1 = vcmp.eq.s32.totalorder %v2612_v4, 0 }
 0x186   : > { %v1995_v60 = vpop.eup %1994  ;;  %v1102_v39 = vmul.f32 1.442695, %v1089_v34  ;;  %v1134_v5 = vmul.f32 1.442695, %v1121_v37  ;;  %vm980_vm5 = vcmp.eq.s32.totalorder %v2612_v4, 1  ;;  %v925_v9 = vsub.f32 %v2599_v52, %v2628_v59  ;;  %v2662_v37 = vpop.f32.mrf.mxu0 }
 0x187   : > { %v1997_v63 = vpop.eup %1996  ;;  %v1316_v44 = vadd.f32 %v1995_v60, %v1284_v41  ;;  %v2656_v16 = vsel %vm1238_vm13, %v2621_v19, %v2619_v58  ;;  %v2664_v60 = vpop.f32.mrf.mxu1  ;;  %v1370_v61 = vsub.f32 %v1362_v40, %v2528_v28  ;;  %v2667_v24 = vadd.f32 %v1332_v36, %v1167_v26 }
 0x188   : > { %v1999_v13 = vpop.eup %1998  ;;  %v1285_v25 = vmul.f32 %v1997_v63, %v1144_v48  ;;  %2004 = vpow2.f32 %v1102_v39  ;;  %v1262_v34 = vsub.f32 %v2619_v58, %v2656_v16  ;;  %v1294_v41 = vsub.f32 %v2621_v19, %v2656_v16 }
 0x189   : > { %v2001_v21 = vpop.eup %2000  ;;  %v831_v48 = vsel %vm823_vm1, %v2490_v18, 0.0  ;;  %v949_v39 = vsub.f32 %v2601_v54, %v2628_v59  ;;  %v988_v58 = vsel %vm980_vm5, %v2498_v6, 0.0  ;;  %2006 = vpow2.f32 %v1134_v5  ;;  %v2689_v5 = vpop.f32.mrf.mxu3 }
 0x18a   : > { %v2003_v63 = vpop.eup %2002  ;;  %v1317_v14 = vadd.f32 %v2001_v21, %v1285_v25  ;;  %v1275_v8 = vmul.f32 1.442695, %v1262_v34  ;;  %v1350_v31 = vmul.f32 0.6931472, %v1993_v38  ;;  %2008 = vlog2.f32 %v1316_v44 }
 0x18b   : > { %v1307_v28 = vmul.f32 1.442695, %v1294_v41  ;;  %vm902_vm6 = vcmp.gt.f32.partialorder %v2664_v60, %v2662_v37  ;;  %vm1152_vm12 = vcmp.eq.s32.totalorder %v2478_v57, 2  ;;  %v939_v26 = vmul.f32 1.442695, %v925_v9 }
 0x18c   : > { %2010 = vlog2.f32 %v1317_v14  ;;  %v2685_v40 = vsel %vm902_vm6, %v2664_v60, %v2662_v37  ;;  %v972_v21 = vadd.f32 %v2003_v63, %v1999_v13  ;;  %v963_v36 = vmul.f32 1.442695, %v949_v39  ;;  %v2710_v63 = vpop.f32.mrf.mxu2 }
 0x18d   : > { %2970 = vst [vmem:[#allocation17_spill] sm:$0xff] %v2685_v40  ;;  %2012 = vpow2.f32 %v1275_v8  ;;  %v926_v38 = vsub.f32 %v2662_v37, %v2685_v40  ;;  %v2692_v25 = vmul.f32 %v2401_v53, %v1370_v61  ;;  %vm1325_vm7 = vcmp.eq.s32.totalorder %v2478_v57, 3 }
 0x18e   : > { %v2005_v44 = vpop.eup %2004  ;;  %v950_v14 = vsub.f32 %v2664_v60, %v2685_v40  ;;  %vm1066_vm0 = vcmp.gt.f32.partialorder %v2646_v29, %v2628_v59  ;;  %v2700_v9 = vadd.f32 %v1350_v31, %v2392_v50  ;;  %v1160_v8 = vsel %vm1152_vm12, %v2500_v7, 0.0 }
 0x18f   : > { %v1113_v13 = vmul.f32 %v2005_v44, %v972_v21  ;;  %2014 = vpow2.f32 %v1307_v28  ;;  %v2007_v34 = vpop.eup %2006  ;;  %v996_v41 = vadd.f32 %v988_v58, %v831_v48  ;;  %v941_v61 = vmul.f32 1.442695, %v926_v38 }
 0x190   : > { %2016 = vpow2.f32 %v939_v26  ;;  %v2708_v39 = vsel %vm1066_vm0, %v2646_v29, %v2628_v59  ;;  %v2009_v53 = vpop.eup %2008  ;;  %v1168_v28 = vadd.f32 %v1160_v8, %v2603_v2  ;;  %v1333_v26 = vsel %vm1325_vm7, %v2559_v56, 0.0 }
 0x191   : > { %2971 = vst [vmem:[#allocation18_spill] sm:$0xff] %v2708_v39  ;;  %2018 = vpow2.f32 %v963_v36  ;;  %v1145_v50 = vadd.f32 %v2007_v34, %v1113_v13  ;;  %v1090_v31 = vsub.f32 %v2628_v59, %v2708_v39  ;;  %v1122_v58 = vsub.f32 %v2646_v29, %v2708_v39  ;;  %v2750_v56 = vpop.f32.mrf.mxu3 }
 0x192   : > { %v2011_v48 = vpop.eup %2010  ;;  %v965_v21 = vmul.f32 1.442695, %v950_v14  ;;  %vm2949_vm2 = vcmp.gt.f32.partialorder %v2689_v5, %v2708_v39  ;;  %v1371_v36 = vsub.f32 %v2700_v9, %v2594_v46  ;;  %vm2954_vm1 = vcmp.gt.f32.partialorder %v2710_v63, %v2685_v40 }
 0x193   : > { %v2013_v38 = vpop.eup %2012  ;;  %v1104_v44 = vmul.f32 1.442695, %v1090_v31  ;;  %v1136_v13 = vmul.f32 1.442695, %v1122_v58  ;;  %vm1153_vm5 = vcmp.eq.s32.totalorder %v2612_v4, 2  ;;  %2020 = vpow2.f32 %v941_v61 }
 0x194   : > { %v1286_v2 = vmul.f32 %v2013_v38, %v1145_v50  ;;  %v2732_v14 = vsel %vm2949_vm2, %v2689_v5, %v2708_v39  ;;  %v1352_v34 = vmul.f32 0.6931472, %v2009_v53  ;;  %v1354_v58 = vmul.f32 0.6931472, %v2011_v48  ;;  %v2746_v53 = vld [vmem:[%s2209_s5 + $0x30] sm:$0xff] }
 0x195   : > { %2972 = vst [vmem:[#allocation19_spill] sm:$0xff] %v2732_v14  ;;  %v2015_v8 = vpop.eup %2014  ;;  %2022 = vpow2.f32 %v1104_v44  ;;  %v1263_v46 = vsub.f32 %v2708_v39, %v2732_v14  ;;  %v1295_v9 = vsub.f32 %v2689_v5, %v2732_v14  ;;  %v2743_v61 = vsel %vm2954_vm1, %v2710_v63, %v2685_v40 }
 0x196   : > { %v2017_v31 = vpop.eup %2016  ;;  %v1318_v50 = vadd.f32 %v2015_v8, %v1286_v2  ;;  %2024 = vpow2.f32 %v965_v21  ;;  %2973 = vst [vmem:[#allocation20_spill] sm:$0xff] %v2743_v61  ;;  %v1091_v59 = vsub.f32 %v2685_v40, %v2743_v61  ;;  %v1161_v48 = vsel %vm1153_vm5, %v2582_v22, 0.0 }
 0x197   : > { %v2019_v38 = vpop.eup %2018  ;;  %2026 = vpow2.f32 %v1136_v13  ;;  %v1277_v44 = vmul.f32 1.442695, %v1263_v46  ;;  %v1309_v39 = vmul.f32 1.442695, %v1295_v9  ;;  %v1123_v21 = vsub.f32 %v2710_v63, %v2743_v61 }
 0x198   : > { %2028 = vlog2.f32 %v1318_v50  ;;  %vm2953_vm12 = vcmp.gt.f32.partialorder %v2750_v56, %v2743_v61  ;;  %v1364_v13 = vadd.f32 %v1352_v34, %v2488_v62  ;;  %v1341_v2 = vadd.f32 %v1333_v26, %v1168_v28 }
 0x199   : > { %2030 = vpow2.f32 %v1277_v44  ;;  %v1106_v8 = vmul.f32 1.442695, %v1091_v59  ;;  %v2021_v46 = vpop.eup %2020  ;;  %vm1401_vm7 = vcmp.eq.s32.totalorder %v2505_v10, %v2212_v12  ;;  %vm824_vm2 = vcmp.eq.s32.totalorder %v2746_v53, 0 }
 0x19a   : > { %v973_v9 = vadd.f32 %v2019_v38, %v2017_v31  ;;  %2032 = vpow2.f32 %v1309_v39  ;;  %v1138_v50 = vmul.f32 1.442695, %v1123_v21  ;;  %v1365_v22 = vadd.f32 %v1354_v58, %v2580_v45 }
 0x19b   : > { %v2023_v40 = vpop.eup %2022  ;;  %v1169_v14 = vadd.f32 %v1161_v48, %v996_v41  ;;  %2034 = vpow2.f32 %v1106_v8  ;;  %v2769_v62 = vsel %vm2953_vm12, %v2750_v56, %v2743_v61  ;;  %vm1326_vm5 = vcmp.eq.s32.totalorder %v2612_v4, 3 }
 0x19c   : > { %2974 = vst [vmem:[#allocation21_spill] sm:$0xff] %v2769_v62  ;;  %v2025_v59 = vpop.eup %2024  ;;  %v1114_v28 = vmul.f32 %v2023_v40, %v973_v9  ;;  %v1264_v39 = vsub.f32 %v2743_v61, %v2769_v62  ;;  %v1296_v26 = vsub.f32 %v2750_v56, %v2769_v62  ;;  %v1379_v41 = vmul.f32 %v2455_v20, %v1371_v36 }
 0x19d   : > { %v2027_v45 = vpop.eup %2026  ;;  %v1372_v34 = vsub.f32 %v1364_v13, %v2667_v24  ;;  %v832_v31 = vsel %vm824_vm2, %v2599_v52, 0.0  ;;  %2036 = vpow2.f32 %v1138_v50  ;;  %vm981_vm12 = vcmp.eq.s32.totalorder %v2746_v53, 1 }
 0x19e   : > { %v2029_v58 = vpop.eup %2028  ;;  %v1146_v40 = vadd.f32 %v2027_v45, %v1114_v28  ;;  %v1279_v38 = vmul.f32 1.442695, %v1264_v39  ;;  %v1311_v44 = vmul.f32 1.442695, %v1296_v26  ;;  %v1373_v21 = vsub.f32 %v1365_v22, %v1341_v2 }
 0x19f   : > { %v2031_v48 = vpop.eup %2030  ;;  %v1334_v8 = vsel %vm1326_vm5, %v2621_v19, 0.0  ;;  %v1356_v36 = vmul.f32 0.6931472, %v2029_v58  ;;  %vm689_vm1 = vcmp.ge.s32.totalorder %v2478_v57, 0  ;;  %v974_v9 = vadd.f32 %v2025_v59, %v2021_v46 }
 0x1a0   : > { %v2033_v24 = vpop.eup %2032  ;;  %v1342_v13 = vadd.f32 %v1334_v8, %v1169_v14  ;;  %2038 = vpow2.f32 %v1279_v38  ;;  %v1287_v50 = vmul.f32 %v2031_v48, %v1146_v40  ;;  %vm690_vm2 = vcmp.ge.s32.totalorder %v2612_v4, 0 }
 0x1a1   : > { %v2035_v61 = vpop.eup %2034  ;;  %v1366_v62 = vadd.f32 %v1356_v36, %v2656_v16  ;;  %v1380_v28 = vmul.f32 %v2638_v23, %v1372_v34  ;;  %v1385_v22 = vadd.f32 %v2692_v25, %v2447_v11  ;;  %2040 = vpow2.f32 %v1311_v44 }
 0x1a2   : > { %v1115_v2 = vmul.f32 %v2035_v61, %v974_v9  ;;  %v2792_v39 = vsel %vm689_vm1, 1.0, %v2969_v33  ;;  %v1319_v14 = vadd.f32 %v2033_v24, %v1287_v50  ;;  %vm1154_vm5 = vcmp.eq.s32.totalorder %v2746_v53, 2  ;;  %v2807_v61 = vld [vmem:[%s2209_s5 + $0x38] sm:$0xff] }
 0x1a3   : > { %v2037_v46 = vpop.eup %2036  ;;  %v1374_v59 = vsub.f32 %v1366_v62, %v1342_v13  ;;  %v1381_v16 = vmul.f32 %v2792_v39, %v1373_v21  ;;  %v1386_v26 = vadd.f32 %v1385_v22, %v1379_v41  ;;  %v989_v45 = vsel %vm981_vm12, %v2601_v54, 0.0  ;;  %v2982_v22 = vld [vmem:[#allocation19_spill] sm:$0xff] }
 0x1a4   : > { %v1147_v34 = vadd.f32 %v2037_v46, %v1115_v2  ;;  %v2800_v11 = vsel %vm690_vm2, 1.0, %v2969_v33  ;;  %2042 = vlog2.f32 %v1319_v14  ;;  %v1409_v25 = vsel %vm1401_vm7, 1.0, %v2969_v33 }
 0x1a5   : > { %v1382_v62 = vmul.f32 %v2800_v11, %v1374_v59  ;;  %v1387_v58 = vadd.f32 %v1386_v26, %v1380_v28  ;;  %vm2975_vm1 = vcmp.gt.f32.partialorder %v2307_v55, %v2301_v49  ;;  %v2976_v38 = vmov 0  }
 0x1a6   : > { %v2039_v41 = vpop.eup %2038  ;;  %v1242_v40 = vsel %vm2975_vm1, 3, %v2526_v27  ;;  %vm2977_vm12 = vcmp.gt.f32.partialorder %v2331_v3, %v2327_v0  ;;  %v1162_v48 = vsel %vm1154_vm5, %v2646_v29, 0.0  ;;  %vm2978_vm7 = vcmp.gt.f32.partialorder %v2359_v30, %v2349_v17 }
 0x1a7   : > { %v906_v44 = vsel %vm2977_vm12, 1, %v2976_v38  ;;  %v1243_v12 = vsel %vm2978_vm7, 3, %v2564_v1  ;;  %v997_v10 = vadd.f32 %v989_v45, %v832_v31  ;;  %v1288_v21 = vmul.f32 %v2039_v41, %v1147_v34  ;;  %v2041_v36 = vpop.eup %2040 }
 0x1a8   : > { %v1388_v8 = vadd.f32 %v1387_v58, %v1381_v16  ;;  %v1417_v24 = vmul.f32 %v2384_v47, %v1409_v25  ;;  %v1071_v49 = vsel %vm1063_vm10, 2, %v906_v44  ;;  %vm825_vm2 = vcmp.eq.s32.totalorder %v2807_v61, 0  ;;  %v2985_v16 = vld [vmem:[#allocation7_spill] sm:$0xff]  ;;  %v2989_v44 = vld [vmem:[#allocation6_spill] sm:$0xff] }
 0x1a9   : > { %vm982_vm1 = vcmp.eq.s32.totalorder %v2807_v61, 1  ;;  %v1170_v55 = vadd.f32 %v1162_v48, %v997_v10  ;;  %vm1327_vm5 = vcmp.eq.s32.totalorder %v2746_v53, 3  ;;  %v1320_v0 = vadd.f32 %v2041_v36, %v1288_v21  ;;  %v2991_v21 = vld [vmem:[#allocation17_spill] sm:$0xff] }
 0x1aa   : > { %v1389_v3 = vadd.f32 %v1388_v8, %v1382_v62  ;;  %v2043_v17 = vpop.eup %2042  ;;  %vm1402_vm12 = vcmp.eq.s32.totalorder %v1242_v40, %v2342_v15  ;;  %vm1403_vm7 = vcmp.eq.s32.totalorder %v1243_v12, %v2364_v32  ;;  %v907_v30 = vsel %vm899_vm15, 1, %v2976_v38 }
 0x1ab   : > { %vm1155_vm10 = vcmp.eq.s32.totalorder %v2807_v61, 2  ;;  %v833_v35 = vsel %vm825_vm2, %v2662_v37, 0.0  ;;  %v990_v47 = vsel %vm982_vm1, %v2664_v60, 0.0  ;;  %2044 = vlog2.f32 %v1320_v0  ;;  %v2996_v0 = vld [vmem:[#allocation20_spill] sm:$0xff] }
 0x1ac   : > { %v1358_v51 = vmul.f32 0.6931472, %v2043_v17  ;;  %v1244_v31 = vsel %vm1236_vm14, 3, %v1071_v49  ;;  %v908_v13 = vsel %vm900_vm9, 1, %v2976_v38  ;;  %v1072_v43 = vsel %vm1064_vm3, 2, %v907_v30  ;;  %v2993_v49 = vld [vmem:[#allocation18_spill] sm:$0xff] }
 0x1ad   : > { %v1335_v9 = vsel %vm1327_vm5, %v2689_v5, 0.0  ;;  %v1163_v28 = vsel %vm1155_vm10, %v2710_v63, 0.0  ;;  %vm691_vm15 = vcmp.ge.s32.totalorder %v2746_v53, 0  ;;  %v1410_v14 = vsel %vm1402_vm12, 1.0, %v2969_v33 }
 0x1ae   : > { %v1343_v50 = vadd.f32 %v1335_v9, %v1170_v55  ;;  %v1367_v2 = vadd.f32 %v1358_v51, %v2982_v22  ;;  %v1411_v18 = vsel %vm1403_vm7, 1.0, %v2969_v33  ;;  %v1073_v46 = vsel %vm1065_vm11, 2, %v908_v13 }
 0x1af   : > { %v998_v59 = vadd.f32 %v990_v47, %v833_v35  ;;  %vm1404_vm14 = vcmp.eq.s32.totalorder %v1244_v31, %v2985_v16  ;;  %v1245_v34 = vsel %vm1237_vm8, 3, %v1072_v43  ;;  %v909_v15 = vsel %vm901_vm4, 1, %v2976_v38 }
 0x1b0   : > { %v1375_v25 = vsub.f32 %v1367_v2, %v1343_v50  ;;  %v1074_v62 = vsel %vm1066_vm0, 2, %v909_v15  ;;  %vm1328_vm9 = vcmp.eq.s32.totalorder %v2807_v61, 3  ;;  %v1731_v41 = vsel %vm691_vm15, 1.0, %v2969_v33 }
 0x1b1   : > { %v1171_v58 = vadd.f32 %v1163_v28, %v998_v59  ;;  %v2045_v40 = vpop.eup %2044  ;;  %v1418_v48 = vmul.f32 %v2989_v44, %v1410_v14  ;;  %v1246_v10 = vsel %vm1238_vm13, 3, %v1073_v46  ;;  %v910_v52 = vsel %vm902_vm6, 1, %v2976_v38 }
 0x1b2   : > { %v1383_v54 = vmul.f32 %v1731_v41, %v1375_v25  ;;  %v1419_v29 = vmul.f32 %v2455_v20, %v1411_v18  ;;  %vm1405_vm3 = vcmp.eq.s32.totalorder %v1245_v34, %v2478_v57  ;;  %vm2992_vm8 = vcmp.gt.f32.partialorder %v2710_v63, %v2991_v21  ;;  %v2995_v57 = vld [vmem:[#allocation21_spill] sm:$0xff] }
 0x1b3   : > { %v1075_v8 = vsel %vm2992_vm8, 2, %v910_v52  ;;  %v1360_v36 = vmul.f32 0.6931472, %v2045_v40  ;;  %v1412_v19 = vsel %vm1404_vm14, 1.0, %v2969_v33  ;;  %vm2994_vm11 = vcmp.gt.f32.partialorder %v2689_v5, %v2993_v49 }
 0x1b4   : > { %v1247_v55 = vsel %vm2994_vm11, 3, %v1074_v62  ;;  %v1336_v37 = vsel %vm1328_vm9, %v2750_v56, 0.0  ;;  %v1390_v60 = vadd.f32 %v1389_v3, %v1383_v54  ;;  %vm1406_vm4 = vcmp.eq.s32.totalorder %v1246_v10, %v2612_v4 }
 0x1b5   : > { %v1344_v20 = vadd.f32 %v1336_v37, %v1171_v58  ;;  %v1368_v38 = vadd.f32 %v1360_v36, %v2995_v57  ;;  %vm692_vm13 = vcmp.ge.s32.totalorder %v2807_v61, 0  ;;  %v1413_v63 = vsel %vm1405_vm3, 1.0, %v2969_v33 }
 0x1b6   : > { %vm2997_vm6 = vcmp.gt.f32.partialorder %v2750_v56, %v2996_v0  ;;  %v1425_v30 = vadd.f32 %v1418_v48, %v1417_v24  ;;  %v1420_v5 = vmul.f32 %v2638_v23, %v1412_v19  ;;  %vm1407_vm0 = vcmp.eq.s32.totalorder %v1247_v55, %v2746_v53 }
 0x1b7   : > { %v1248_v17 = vsel %vm2997_vm6, 3, %v1075_v8  ;;  %v1376_v35 = vsub.f32 %v1368_v38, %v1344_v20  ;;  %v1732_v3 = vsel %vm692_vm13, 1.0, %v2969_v33  ;;  %v1414_v4 = vsel %vm1406_vm4, 1.0, %v2969_v33 }
 0x1b8   : > { %vm1408_vm2 = vcmp.eq.s32.totalorder %v1248_v17, %v2807_v61  ;;  %v1421_v51 = vmul.f32 %v2792_v39, %v1413_v63  ;;  %v1426_v27 = vadd.f32 %v1425_v30, %v1419_v29  ;;  %v1415_v1 = vsel %vm1407_vm0, 1.0, %v2969_v33 }
 0x1b9   : > { %v1384_v47 = vmul.f32 %v1732_v3, %v1376_v35  ;;  %v1422_v24 = vmul.f32 %v2800_v11, %v1414_v4  ;;  %v1416_v23 = vsel %vm1408_vm2, 1.0, %v2969_v33  ;;  %v1423_v53 = vmul.f32 %v1731_v41, %v1415_v1 }
 0x1ba   : > { %v1427_v31 = vadd.f32 %v1426_v27, %v1420_v5  ;;  %v1424_v42 = vmul.f32 %v1732_v3, %v1416_v23  ;;  %v1441_v26 = vlaneseq }
 0x1bb   : > { %v1391_v56 = vadd.f32 %v1390_v60, %v1384_v47 }
 0x1bc   : > { %v1428_v13 = vadd.f32 %v1427_v31, %v1421_v51  ;;  %v1442_v45 = vshrl.u32 %v1441_v26, 7  ;;  %v1445_v15 = vand.u32 127, %v1441_v26 }
 0x1bd   : > { %1392 = vadd.xlane.f32.xlu0 %v1391_v56 }
 0x1be   : > { %v1429_v43 = vadd.f32 %v1428_v13, %v1422_v24  ;;  %v1443_v34 = vmul.u32 128, %v1442_v45 }
 0x1c0   : > { %v1430_v9 = vadd.f32 %v1429_v43, %v1423_v53  ;;  %v1446_v25 = vadd.s32 %v1445_v15, %v1443_v34 }
 0x1c2   : > { %v1431_v50 = vadd.f32 %v1430_v9, %v1424_v42  ;;  %vm1448_vm1 = vcmp.eq.s32.totalorder %v1446_v25, 1  ;;  %vm1447_vm5 = vcmp.eq.s32.totalorder %v1446_v25, 0 }
 0x1c5   : > { %1432 = vadd.xlane.f32.xlu0 %v1431_v50 }
 0x230   : > { %v1393_v61 = vpop.xlane.xlu0 %1392 }
 0x231   : > { %v1394_v28 = vrot.slane %v1393_v61, 4 }
 0x233   : > { %v1395_v39 = vadd.f32 %v1394_v28, %v1393_v61 }
 0x235   : > { %v1396_v22 = vrot.slane %v1395_v39, 2 }
 0x237   : > { %v1397_v2 = vadd.f32 %v1396_v22, %v1395_v39 }
 0x238   : > { %v1433_v14 = vpop.xlane.xlu0 %1432 }
 0x239   : > { %v1434_v11 = vrot.slane %v1433_v14, 4  ;;  %v1398_v18 = vrot.slane %v1397_v2, 1 }
 0x23b   : > { %v1435_v6 = vadd.f32 %v1434_v11, %v1433_v14  ;;  %v1399_v33 = vadd.f32 %v1398_v18, %v1397_v2 }
 0x23d   : > { %v1436_v7 = vrot.slane %v1435_v6, 2  ;;  %1891 = vpush %v1399_v33 }
 0x23f   : > { %v1437_v46 = vadd.f32 %v1436_v7, %v1435_v6 }
 0x241   : > { %v1438_v59 = vrot.slane %v1437_v46, 1 }
 0x243   : > { %v1439_v16 = vadd.f32 %v1438_v59, %v1437_v46 }
 0x245   : > { %1893 = vpush %v1439_v16 }
 0x26e   : > { %s1892_s6 = spop %1891 }
 0x26f   : > { %v1451_v62 = vstv %s1892_s6 }
 0x276   : > { %s1894_s7 = spop %1893 }
 0x277   : > { %v1449_v32 = vstv %s1894_s7 }
 0x278   : > { %v1450_v58 = vsel %vm1448_vm1, %v1449_v32, 0.0 }
 0x279   : > { %v1452_v41 = vsel %vm1447_vm5, %v1451_v62, %v1450_v58 }
 0x27a   : > { %1453 = vst [vmem:[%s284_s10] sm:$0xff] %v1452_v41 }
 0x27b PF: > { %s15_s17 = sadd.s32 1, %s2102_s17   ;;  %s2998_s15 = smov %s2098_s16 }
 0x27c   : > { %p12_p9 = scmp.ge.s32.totalorder %s15_s17, 4   ;;  %s2999_s16 = smov %s3001_s19 }
 0x27e   :  { %14 = sbr.rel (!%p12_p9) target bundleno = 2 (0x2), region = 81 }
 0x283   :  { %1479 = vsyncpa [#allocation4], 1 }
 0x284   :  { %1481 = vsyncpa [#allocation4 + $0x1], 1 }

</bundles_post_ra>
